<compile_context>
chip_gen: v6e
topology: v6e:2x2x1
jax: 0.10.0
libtpu: 0.0.40
codegen_flags: <defaults>
</compile_context>

<pallas_src>
import math
import jax
import jax.numpy as jnp
from jax.experimental import pallas as pl
from jax.experimental.pallas import tpu as pltpu


# ----------------------------- config --------------------------------------
class Config:
    d_model = 32
    d_kv = 8
    num_heads = 4
    relative_attention_num_buckets = 32
    relative_attention_max_distance = 128
    dropout_rate = 0.0
    sliding_window = 8          # block_len
    global_block_size = 4
    is_decoder = False
    layer_norm_epsilon = 1e-6


def _round_up(x, m):
    return ((x + m - 1) // m) * m


# --------------------------- Pallas: fused linear ----------------------------
def _linear_kernel(x_ref, w_ref, o_ref):
    o_ref[...] = jnp.dot(
        x_ref[...], w_ref[...], preferred_element_type=jnp.float32
    ).astype(o_ref.dtype)


def pallas_linear(x, w_t, *, tm_max=512):
    """x: (M, K) @ w_t: (K, N) -> (M, N), tiled over M."""
    M, K = x.shape
    N = w_t.shape[1]
    tm = min(tm_max, _round_up(M, 8))
    Mp = _round_up(M, tm)
    if Mp != M:
        x = jnp.pad(x, ((0, Mp - M), (0, 0)))
    cost = pl.CostEstimate(
        flops=2 * Mp * K * N,
        transcendentals=0,
        bytes_accessed=4 * (Mp * K + K * N + Mp * N),
    )
    out = pl.pallas_call(
        _linear_kernel,
        out_shape=jax.ShapeDtypeStruct((Mp, N), x.dtype),
        grid=(Mp // tm,),
        in_specs=[
            pl.BlockSpec((tm, K), lambda i: (i, 0)),
            pl.BlockSpec((K, N), lambda i: (0, 0)),
        ],
        out_specs=pl.BlockSpec((tm, N), lambda i: (i, 0)),
        compiler_params=pltpu.CompilerParams(
            dimension_semantics=("parallel",),
            vmem_limit_bytes=32 * 1024 * 1024,
        ),
        cost_estimate=cost,
    )(x, w_t)
    return out[:M] if Mp != M else out


# ------------------- Pallas: transient-global block attention ----------------
def _tglobal_attn_kernel(q_ref, k0_ref, k1_ref, k2_ref, v0_ref, v1_ref, v2_ref,
                         sk_ref, sv_ref, lb_ref, sb_ref, o_ref,
                         k_s, v_s, b_s):
    H = q_ref.shape[1]
    bl = q_ref.shape[2]
    D = q_ref.shape[3]

    # Assemble K/V window [prev | cur | next | global] in VMEM scratch.
    k_s[:, 0 * bl:1 * bl, :] = k0_ref[0]
    k_s[:, 1 * bl:2 * bl, :] = k1_ref[0]
    k_s[:, 2 * bl:3 * bl, :] = k2_ref[0]
    k_s[:, 3 * bl:, :] = sk_ref[0]
    v_s[:, 0 * bl:1 * bl, :] = v0_ref[0]
    v_s[:, 1 * bl:2 * bl, :] = v1_ref[0]
    v_s[:, 2 * bl:3 * bl, :] = v2_ref[0]
    v_s[:, 3 * bl:, :] = sv_ref[0]

    # Assemble bias [local relative | side/global] in VMEM scratch (f32).
    b_s[:, :, :3 * bl] = lb_ref[0].astype(jnp.float32)
    b_s[:, :, 3 * bl:] = sb_ref[0].astype(jnp.float32)

    q = q_ref[0]                                   # (H, bl, D)
    scores = jnp.einsum("hqd,hkd->hqk", q, k_s[...],
                        preferred_element_type=jnp.float32) + b_s[...]
    m = jnp.max(scores, axis=-1, keepdims=True)
    e = jnp.exp(scores - m)
    denom = jnp.sum(e, axis=-1, keepdims=True)
    p = e * pl.reciprocal(denom, approx=True)      # EUP instead of VPU divide
    out = jnp.einsum("hqk,hkd->hqd", p.astype(v_s.dtype), v_s[...],
                     preferred_element_type=jnp.float32)   # (H, bl, D)

    # Lane-dense output: heads folded onto the lane axis -> (bl, H*D).
    for h in range(H):
        o_ref[0, :, h * D:(h + 1) * D] = out[h].astype(o_ref.dtype)


def pallas_block_attention(q_pad, k_pad, v_pad, side_k, side_v,
                           local_bias, side_bias, bl, nb):
    """q_pad:      (B, H, nb*bl, D)
       k/v_pad:    (B, H, (nb+2)*bl, D)   (one zero block of padding each side)
       side_k/v:   (B, H, G, D)
       local_bias: (1, H, bl, 3*bl)
       side_bias:  (B, H, nb*bl, G)
       returns     (B, nb*bl, H*D) lane-dense attention output."""
    B, H, Sp, D = q_pad.shape
    G = side_k.shape[2]
    KL = 3 * bl + G
    inner = H * D

    cost = pl.CostEstimate(
        flops=4 * B * nb * H * bl * KL * D,
        transcendentals=B * nb * H * bl * KL,
        bytes_accessed=4 * (B * Sp * H * D                       # q
                            + 2 * 3 * B * (nb + 2) * bl * H * D  # k, v (3x window reads)
                            + 2 * B * G * H * D                  # side k/v
                            + H * bl * 3 * bl + B * Sp * H * G   # biases
                            + B * Sp * inner),                   # output
    )

    return pl.pallas_call(
        _tglobal_attn_kernel,
        out_shape=jax.ShapeDtypeStruct((B, Sp, inner), q_pad.dtype),
        grid=(B, nb),
        in_specs=[
            pl.BlockSpec((1, H, bl, D), lambda b, i: (b, 0, i, 0)),       # q block
            pl.BlockSpec((1, H, bl, D), lambda b, i: (b, 0, i, 0)),       # k prev
            pl.BlockSpec((1, H, bl, D), lambda b, i: (b, 0, i + 1, 0)),   # k cur
            pl.BlockSpec((1, H, bl, D), lambda b, i: (b, 0, i + 2, 0)),   # k next
            pl.BlockSpec((1, H, bl, D), lambda b, i: (b, 0, i, 0)),       # v prev
            pl.BlockSpec((1, H, bl, D), lambda b, i: (b, 0, i + 1, 0)),   # v cur
            pl.BlockSpec((1, H, bl, D), lambda b, i: (b, 0, i + 2, 0)),   # v next
            pl.BlockSpec((1, H, G, D), lambda b, i: (b, 0, 0, 0)),        # side_k (resident)
            pl.BlockSpec((1, H, G, D), lambda b, i: (b, 0, 0, 0)),        # side_v (resident)
            pl.BlockSpec((1, H, bl, 3 * bl), lambda b, i: (0, 0, 0, 0)),  # local bias (resident)
            pl.BlockSpec((1, H, bl, G), lambda b, i: (b, 0, i, 0)),       # side bias block
        ],
        out_specs=pl.BlockSpec((1, bl, inner), lambda b, i: (b, i, 0)),
        scratch_shapes=[
            pltpu.VMEM((H, KL, D), jnp.float32),   # assembled K window
            pltpu.VMEM((H, KL, D), jnp.float32),   # assembled V window
            pltpu.VMEM((H, bl, KL), jnp.float32),  # assembled bias
        ],
        compiler_params=pltpu.CompilerParams(
            dimension_semantics=("parallel", "parallel"),
            vmem_limit_bytes=32 * 1024 * 1024,
        ),
        cost_estimate=cost,
    )(q_pad, k_pad, k_pad, k_pad, v_pad, v_pad, v_pad,
      side_k, side_v, local_bias, side_bias)


# ------------------------ plain-JAX glue helpers -----------------------------
def relative_position_bucket(rel, bidirectional, num_buckets, max_distance):
    relative_buckets = jnp.zeros_like(rel)
    if bidirectional:
        num_buckets //= 2
        relative_buckets = relative_buckets + (rel > 0).astype(rel.dtype) * num_buckets
        rel = jnp.abs(rel)
    else:
        rel = -jnp.minimum(rel, 0)
    max_exact = num_buckets // 2
    is_small = rel < max_exact
    rel_f = jnp.maximum(rel, 1).astype(jnp.float32)  # guard log(0); masked by is_small
    rel_if_large = max_exact + (
        jnp.log(rel_f / max_exact)
        / math.log(max_distance / max_exact)
        * (num_buckets - max_exact)
    ).astype(rel.dtype)
    rel_if_large = jnp.minimum(rel_if_large, num_buckets - 1)
    return relative_buckets + jnp.where(is_small, rel, rel_if_large)


def make_global_fixed_block_ids(attention_mask, global_block_size):
    B, S = attention_mask.shape
    fixed = jnp.ones_like(attention_mask) / global_block_size
    fixed = jnp.cumsum(fixed, axis=1) - fixed
    m = jnp.where(attention_mask != 0.0, 1.0, -1000.0).astype(attention_mask.dtype)
    gbi = jnp.floor(m + fixed - 1.0).astype(attention_mask.dtype)
    gbi = jnp.where(gbi > -1.0, gbi, -1.0)
    gbi = gbi * attention_mask + (attention_mask - 1.0)
    block_ends = (jnp.arange(S) % global_block_size) == (global_block_size - 1)
    true_block_ends = jnp.logical_and(block_ends[None, :], gbi >= 0)
    full_blocks = true_block_ends.sum(-1, keepdims=True).astype(gbi.dtype) - 1.0
    gbi = jnp.where(gbi < full_blocks, gbi, full_blocks)
    num_globals = S // global_block_size
    if num_globals > 0:
        seq_max = jnp.broadcast_to(jnp.max(gbi, axis=-1, keepdims=True), (B, num_globals))
    else:
        seq_max = jnp.zeros((B, 0), dtype=gbi.dtype)
    gsi = jnp.cumsum(jnp.ones((B, num_globals), dtype=attention_mask.dtype), axis=-1) - 1.0
    gsi = jnp.where(gsi <= seq_max, 1.0, 0.0).astype(attention_mask.dtype)
    return gbi.astype(jnp.int32), gsi


def create_global_aggregates(hidden_states, block_ids, global_seq_len):
    block_ids = jnp.where(block_ids >= 0, block_ids, global_seq_len)
    one_hot = jax.nn.one_hot(block_ids, global_seq_len + 1,
                             dtype=hidden_states.dtype)[:, :, :-1]
    return jnp.einsum("bnd,bng->bgd", hidden_states, one_hot)


def t5_layer_norm(x, weight, eps):
    variance = jnp.mean(jnp.square(x.astype(jnp.float32)), axis=-1, keepdims=True)
    y = x.astype(jnp.float32) * jax.lax.rsqrt(variance + eps)
    return (weight * y).astype(x.dtype)


def compute_local_bias(block_len, rel_bias_emb, cfg):
    mem = jnp.arange(3 * block_len, dtype=jnp.int32)
    ctx = mem[block_len:-block_len]
    rel = mem[None, :] - ctx[:, None]                       # (bl, 3bl)
    buckets = relative_position_bucket(
        rel, not cfg.is_decoder,
        cfg.relative_attention_num_buckets, cfg.relative_attention_max_distance)
    values = rel_bias_emb[buckets]                          # (bl, 3bl, H)
    return jnp.transpose(values, (2, 0, 1))[None]           # (1, H, bl, 3bl)


def compute_side_bias(mask, global_segment_ids, rel_bias_emb, cfg):
    # (B, 1, S, G)
    side_attention_mask = (mask[..., None] == global_segment_ids[:, None, :])[:, None, ...]
    attention_side_bias = jnp.where(side_attention_mask, 0.0, -1e10).astype(jnp.float32)
    block_ids, _ = make_global_fixed_block_ids(mask, cfg.global_block_size)
    G = global_segment_ids.shape[-1]
    side_rel = jnp.arange(G, dtype=jnp.int32)[None, None, :] - block_ids[:, :, None]  # (B,S,G)
    buckets = relative_position_bucket(
        side_rel, not cfg.is_decoder,
        cfg.relative_attention_num_buckets, cfg.relative_attention_max_distance)
    side_bias = rel_bias_emb[buckets]                       # (B,S,G,H)
    side_bias = jnp.transpose(side_bias, (0, 3, 1, 2))      # (B,H,S,G)
    return attention_side_bias + side_bias                  # (B,H,S,G)


# ----------------------------- forward pass ----------------------------------
def t5_transient_global_attention(hidden_states, params, cfg, mask=None,
                                  return_position_bias=False):
    B, S, d_model = hidden_states.shape
    H, D = cfg.num_heads, cfg.d_kv
    inner = H * D
    bl = cfg.sliding_window
    dtype = hidden_states.dtype

    if mask is None:
        mask = jnp.ones((B, S), dtype=dtype)
    # TODO(synk): the -1e10 local attention mask for a *user-provided* mask is
    # not applied (module's mask=None behavior is what is reproduced here).

    block_ids, global_segment_ids = make_global_fixed_block_ids(mask, cfg.global_block_size)
    G = global_segment_ids.shape[-1]
    global_inputs = create_global_aggregates(hidden_states, block_ids, G)
    global_inputs = t5_layer_norm(global_inputs, params["ln_weight"], cfg.layer_norm_epsilon)

    # Fused q|k|v projection for tokens AND global aggregates: one matmul
    # kernel launch, x read from HBM once.  (The global rows' q columns are a
    # tiny amount of wasted MXU work, G << S.)
    w_qkv = jnp.concatenate([params["wq_t"], params["wk_t"], params["wv_t"]], axis=1)
    x_all = jnp.concatenate(
        [hidden_states.reshape(B * S, d_model), global_inputs.reshape(B * G, d_model)],
        axis=0)
    qkv_all = pallas_linear(x_all, w_qkv)                     # (B*S + B*G, 3*inner)
    qkv = qkv_all[:B * S].reshape(B, S, 3 * inner)
    side_kv = qkv_all[B * S:].reshape(B, G, 3 * inner)
    q = qkv[..., :inner]
    k = qkv[..., inner:2 * inner]
    v = qkv[..., 2 * inner:]
    side_k = side_kv[..., inner:2 * inner]
    side_v = side_kv[..., 2 * inner:]

    def shape_heads(x):  # (B, L, inner) -> (B, H, L, D)
        return x.reshape(B, x.shape[1], H, D).transpose(0, 2, 1, 3)

    qh, kh, vh = shape_heads(q), shape_heads(k), shape_heads(v)
    skh, svh = shape_heads(side_k), shape_heads(side_v)

    pad = (-S) % bl
    Sp = S + pad
    nb = Sp // bl

    q_pad = jnp.pad(qh, ((0, 0), (0, 0), (0, pad), (0, 0)))
    # Local K/V stay at 1x in HBM: one zero block of padding on each side; the
    # kernel reads the overlapping [i-1, i, i+1] window directly.
    k_pad = jnp.pad(kh, ((0, 0), (0, 0), (bl, pad + bl), (0, 0)))
    v_pad = jnp.pad(vh, ((0, 0), (0, 0), (bl, pad + bl), (0, 0)))

    local_bias = compute_local_bias(bl, params["rel_bias"], cfg)          # (1,H,bl,3bl)
    side_bias = compute_side_bias(mask, global_segment_ids, params["rel_bias"], cfg)
    side_bias = jnp.pad(side_bias, ((0, 0), (0, 0), (0, pad), (0, 0)))    # (B,H,Sp,G)

    attn = pallas_block_attention(q_pad, k_pad, v_pad, skh, svh,
                                  local_bias, side_bias, bl, nb)          # (B,Sp,inner)
    attn = attn[:, :S, :]
    out = pallas_linear(attn.reshape(B * S, inner), params["wo_t"]).reshape(B, S, d_model)

    if return_position_bias:
        # Only reconstructed on demand; never materialized in the hot path.
        pb = jnp.concatenate(
            [jnp.broadcast_to(local_bias[:, None], (B, nb, H, bl, 3 * bl)),
             side_bias.reshape(B, H, nb, bl, G).transpose(0, 2, 1, 3, 4)],
            axis=-1).astype(dtype).reshape(B * nb, H, bl, 3 * bl + G)
        return out, pb
    return out, None


# ------------------------------ main -----------------------------------------
if __name__ == "__main__":
    cfg = Config()
    inner = cfg.num_heads * cfg.d_kv

    key = jax.random.PRNGKey(0)
    kq, kk, kv, ko, kb, kgb, kx = jax.random.split(key, 7)
    params = {
        # stored transposed relative to nn.Linear.weight so that y = x @ w_t
        "wq_t": 0.05 * jax.random.normal(kq, (cfg.d_model, inner), jnp.float32),
        "wk_t": 0.05 * jax.random.normal(kk, (cfg.d_model, inner), jnp.float32),
        "wv_t": 0.05 * jax.random.normal(kv, (cfg.d_model, inner), jnp.float32),
        "wo_t": 0.05 * jax.random.normal(ko, (inner, cfg.d_model), jnp.float32),
        "rel_bias": 0.05 * jax.random.normal(
            kb, (cfg.relative_attention_num_buckets, cfg.num_heads), jnp.float32),
        # present in __init__ but unused by the module's forward (it reuses
        # relative_attention_bias inside compute_side_bias)
        "global_rel_bias": 0.05 * jax.random.normal(
            kgb, (cfg.relative_attention_num_buckets, cfg.num_heads), jnp.float32),
        "ln_weight": jnp.ones((cfg.d_model,), jnp.float32),
    }

    batch, seq = 2, 16
    hidden_states = jax.random.normal(kx, (batch, seq, cfg.d_model), jnp.float32)

    fwd = jax.jit(lambda x: t5_transient_global_attention(x, params, cfg))
    out, _ = fwd(hidden_states)
    jax.block_until_ready(out)

    assert out.shape == (batch, seq, cfg.d_model)
    assert bool(jnp.all(jnp.isfinite(out)))
    print("KERNEL_OK")
</pallas_src>

<mosaic_0001>
module attributes {stable_mosaic.version = 11 : i64} {
  func.func @_linear_kernel(%arg0: i32, %arg1: memref<40x32xf32, #tpu.memory_space<vmem>>, %arg2: memref<32x96xf32, #tpu.memory_space<vmem>>, %arg3: memref<40x96xf32, #tpu.memory_space<vmem>>) attributes {dimension_semantics = [#tpu.dimension_semantics<parallel>], iteration_bounds = array<i64: 1>, scalar_prefetch = 0 : i64, scratch_operands = 0 : i64, tpu.core_type = #tpu.core_type<tc>, window_params = [{transform_indices = @transform_0, window_bounds = array<i64: 40, 32>}, {pipeline_mode = #tpu.pipeline_mode<synchronous>, transform_indices = @transform_1, window_bounds = array<i64: 32, 96>}, {transform_indices = @transform_2, window_bounds = array<i64: 40, 96>}]} {
    %c0 = arith.constant 0 : index
    %c0_0 = arith.constant 0 : index
    %0 = vector.load %arg1[%c0, %c0_0] : memref<40x32xf32, #tpu.memory_space<vmem>>, vector<40x32xf32>
    %c0_1 = arith.constant 0 : index
    %c0_2 = arith.constant 0 : index
    %1 = vector.load %arg2[%c0_1, %c0_2] : memref<32x96xf32, #tpu.memory_space<vmem>>, vector<32x96xf32>
    %cst = arith.constant dense<0.000000e+00> : vector<40x96xf32>
    %2 = tpu.matmul %0, %1, %cst {dimension_numbers = #tpu.dot_dimension_numbers<[1], [0], [0], [1], [0, 0, 1, 1], [], []>} : vector<40x32xf32>, vector<32x96xf32>, vector<40x96xf32> -> vector<40x96xf32>
    %c0_3 = arith.constant 0 : index
    %c0_4 = arith.constant 0 : index
    %3 = vector.load %arg3[%c0_3, %c0_4] : memref<40x96xf32, #tpu.memory_space<vmem>>, vector<40x96xf32>
    tpu.vector_store %arg3[%c0_3, %c0_4], %2 {strides = array<i32>} : memref<40x96xf32, #tpu.memory_space<vmem>>, vector<40x96xf32>,
    return
  }
  func.func @transform_0(%arg0: i32) -> (i32, i32) {
    %c0_i32 = arith.constant 0 : i32
    %c0_i32_0 = arith.constant 0 : i32
    return %arg0, %c0_i32 : i32, i32
  }
  func.func @transform_1(%arg0: i32) -> (i32, i32) {
    %c0_i32 = arith.constant 0 : i32
    %c0_i32_0 = arith.constant 0 : i32
    %c0_i32_1 = arith.constant 0 : i32
    return %c0_i32, %c0_i32_0 : i32, i32
  }
  func.func @transform_2(%arg0: i32) -> (i32, i32) {
    %c0_i32 = arith.constant 0 : i32
    %c0_i32_0 = arith.constant 0 : i32
    return %arg0, %c0_i32 : i32, i32
  }
}

module attributes {stable_mosaic.version = 11 : i64} {
  func.func @_tglobal_attn_kernel(%arg0: i32, %arg1: i32, %arg2: memref<1x4x8x8xf32, #tpu.memory_space<vmem>>, %arg3: memref<1x4x8x8xf32, #tpu.memory_space<vmem>>, %arg4: memref<1x4x8x8xf32, #tpu.memory_space<vmem>>, %arg5: memref<1x4x8x8xf32, #tpu.memory_space<vmem>>, %arg6: memref<1x4x8x8xf32, #tpu.memory_space<vmem>>, %arg7: memref<1x4x8x8xf32, #tpu.memory_space<vmem>>, %arg8: memref<1x4x8x8xf32, #tpu.memory_space<vmem>>, %arg9: memref<1x4x4x8xf32, #tpu.memory_space<vmem>>, %arg10: memref<1x4x4x8xf32, #tpu.memory_space<vmem>>, %arg11: memref<1x4x8x24xf32, #tpu.memory_space<vmem>>, %arg12: memref<1x4x8x4xf32, #tpu.memory_space<vmem>>, %arg13: memref<1x8x32xf32, #tpu.memory_space<vmem>>, %arg14: memref<4x28x8xf32, #tpu.memory_space<vmem>>, %arg15: memref<4x28x8xf32, #tpu.memory_space<vmem>>, %arg16: memref<4x8x28xf32, #tpu.memory_space<vmem>>) attributes {dimension_semantics = [#tpu.dimension_semantics<parallel>, #tpu.dimension_semantics<parallel>], iteration_bounds = array<i64: 2, 2>, scalar_prefetch = 0 : i64, scratch_operands = 3 : i64, tpu.core_type = #tpu.core_type<tc>, window_params = [{transform_indices = @transform_0, window_bounds = array<i64: 1, 4, 8, 8>}, {transform_indices = @transform_1, window_bounds = array<i64: 1, 4, 8, 8>}, {transform_indices = @transform_2, window_bounds = array<i64: 1, 4, 8, 8>}, {transform_indices = @transform_3, window_bounds = array<i64: 1, 4, 8, 8>}, {transform_indices = @transform_4, window_bounds = array<i64: 1, 4, 8, 8>}, {transform_indices = @transform_5, window_bounds = array<i64: 1, 4, 8, 8>}, {transform_indices = @transform_6, window_bounds = array<i64: 1, 4, 8, 8>}, {transform_indices = @transform_7, window_bounds = array<i64: 1, 4, 4, 8>}, {transform_indices = @transform_8, window_bounds = array<i64: 1, 4, 4, 8>}, {pipeline_mode = #tpu.pipeline_mode<synchronous>, transform_indices = @transform_9, window_bounds = array<i64: 1, 4, 8, 24>}, {transform_indices = @transform_10, window_bounds = array<i64: 1, 4, 8, 4>}, {transform_indices = @transform_11, window_bounds = array<i64: 1, 8, 32>}]} {
    %c0 = arith.constant 0 : index
    %c0_0 = arith.constant 0 : index
    %c0_1 = arith.constant 0 : index
    %c0_2 = arith.constant 0 : index
    %0 = vector.load %arg3[%c0, %c0_0, %c0_1, %c0_2] : memref<1x4x8x8xf32, #tpu.memory_space<vmem>>, vector<1x4x8x8xf32>
    %1 = vector.shape_cast %0 : vector<1x4x8x8xf32> to vector<4x8x8xf32>
    %c0_3 = arith.constant 0 : index
    %c0_4 = arith.constant 0 : index
    %c0_5 = arith.constant 0 : index
    %2 = vector.load %arg14[%c0_3, %c0_4, %c0_5] : memref<4x28x8xf32, #tpu.memory_space<vmem>>, vector<4x8x8xf32>
    tpu.vector_store %arg14[%c0_3, %c0_4, %c0_5], %1 {strides = array<i32>} : memref<4x28x8xf32, #tpu.memory_space<vmem>>, vector<4x8x8xf32>,
    %c0_6 = arith.constant 0 : index
    %c0_7 = arith.constant 0 : index
    %c0_8 = arith.constant 0 : index
    %c0_9 = arith.constant 0 : index
    %3 = vector.load %arg4[%c0_6, %c0_7, %c0_8, %c0_9] : memref<1x4x8x8xf32, #tpu.memory_space<vmem>>, vector<1x4x8x8xf32>
    %4 = vector.shape_cast %3 : vector<1x4x8x8xf32> to vector<4x8x8xf32>
    %c0_10 = arith.constant 0 : index
    %c8 = arith.constant 8 : index
    %c0_11 = arith.constant 0 : index
    %5 = vector.load %arg14[%c0_10, %c8, %c0_11] : memref<4x28x8xf32, #tpu.memory_space<vmem>>, vector<4x8x8xf32>
    tpu.vector_store %arg14[%c0_10, %c8, %c0_11], %4 {strides = array<i32>} : memref<4x28x8xf32, #tpu.memory_space<vmem>>, vector<4x8x8xf32>,
    %c0_12 = arith.constant 0 : index
    %c0_13 = arith.constant 0 : index
    %c0_14 = arith.constant 0 : index
    %c0_15 = arith.constant 0 : index
    %6 = vector.load %arg5[%c0_12, %c0_13, %c0_14, %c0_15] : memref<1x4x8x8xf32, #tpu.memory_space<vmem>>, vector<1x4x8x8xf32>
    %7 = vector.shape_cast %6 : vector<1x4x8x8xf32> to vector<4x8x8xf32>
    %c0_16 = arith.constant 0 : index
    %c16 = arith.constant 16 : index
    %c0_17 = arith.constant 0 : index
    %8 = vector.load %arg14[%c0_16, %c16, %c0_17] : memref<4x28x8xf32, #tpu.memory_space<vmem>>, vector<4x8x8xf32>
    tpu.vector_store %arg14[%c0_16, %c16, %c0_17], %7 {strides = array<i32>} : memref<4x28x8xf32, #tpu.memory_space<vmem>>, vector<4x8x8xf32>,
    %c0_18 = arith.constant 0 : index
    %c0_19 = arith.constant 0 : index
    %c0_20 = arith.constant 0 : index
    %c0_21 = arith.constant 0 : index
    %9 = vector.load %arg9[%c0_18, %c0_19, %c0_20, %c0_21] : memref<1x4x4x8xf32, #tpu.memory_space<vmem>>, vector<1x4x4x8xf32>
    %10 = vector.shape_cast %9 : vector<1x4x4x8xf32> to vector<4x4x8xf32>
    %c0_22 = arith.constant 0 : index
    %c24 = arith.constant 24 : index
    %c0_23 = arith.constant 0 : index
    %11 = vector.load %arg14[%c0_22, %c24, %c0_23] : memref<4x28x8xf32, #tpu.memory_space<vmem>>, vector<4x4x8xf32>
    tpu.vector_store %arg14[%c0_22, %c24, %c0_23], %10 {strides = array<i32>} : memref<4x28x8xf32, #tpu.memory_space<vmem>>, vector<4x4x8xf32>,
    %c0_24 = arith.constant 0 : index
    %c0_25 = arith.constant 0 : index
    %c0_26 = arith.constant 0 : index
    %c0_27 = arith.constant 0 : index
    %12 = vector.load %arg6[%c0_24, %c0_25, %c0_26, %c0_27] : memref<1x4x8x8xf32, #tpu.memory_space<vmem>>, vector<1x4x8x8xf32>
    %13 = vector.shape_cast %12 : vector<1x4x8x8xf32> to vector<4x8x8xf32>
    %c0_28 = arith.constant 0 : index
    %c0_29 = arith.constant 0 : index
    %c0_30 = arith.constant 0 : index
    %14 = vector.load %arg15[%c0_28, %c0_29, %c0_30] : memref<4x28x8xf32, #tpu.memory_space<vmem>>, vector<4x8x8xf32>
    tpu.vector_store %arg15[%c0_28, %c0_29, %c0_30], %13 {strides = array<i32>} : memref<4x28x8xf32, #tpu.memory_space<vmem>>, vector<4x8x8xf32>,
    %c0_31 = arith.constant 0 : index
    %c0_32 = arith.constant 0 : index
    %c0_33 = arith.constant 0 : index
    %c0_34 = arith.constant 0 : index
    %15 = vector.load %arg7[%c0_31, %c0_32, %c0_33, %c0_34] : memref<1x4x8x8xf32, #tpu.memory_space<vmem>>, vector<1x4x8x8xf32>
    %16 = vector.shape_cast %15 : vector<1x4x8x8xf32> to vector<4x8x8xf32>
    %c0_35 = arith.constant 0 : index
    %c8_36 = arith.constant 8 : index
    %c0_37 = arith.constant 0 : index
    %17 = vector.load %arg15[%c0_35, %c8_36, %c0_37] : memref<4x28x8xf32, #tpu.memory_space<vmem>>, vector<4x8x8xf32>
    tpu.vector_store %arg15[%c0_35, %c8_36, %c0_37], %16 {strides = array<i32>} : memref<4x28x8xf32, #tpu.memory_space<vmem>>, vector<4x8x8xf32>,
    %c0_38 = arith.constant 0 : index
    %c0_39 = arith.constant 0 : index
    %c0_40 = arith.constant 0 : index
    %c0_41 = arith.constant 0 : index
    %18 = vector.load %arg8[%c0_38, %c0_39, %c0_40, %c0_41] : memref<1x4x8x8xf32, #tpu.memory_space<vmem>>, vector<1x4x8x8xf32>
    %19 = vector.shape_cast %18 : vector<1x4x8x8xf32> to vector<4x8x8xf32>
    %c0_42 = arith.constant 0 : index
    %c16_43 = arith.constant 16 : index
    %c0_44 = arith.constant 0 : index
    %20 = vector.load %arg15[%c0_42, %c16_43, %c0_44] : memref<4x28x8xf32, #tpu.memory_space<vmem>>, vector<4x8x8xf32>
    tpu.vector_store %arg15[%c0_42, %c16_43, %c0_44], %19 {strides = array<i32>} : memref<4x28x8xf32, #tpu.memory_space<vmem>>, vector<4x8x8xf32>,
    %c0_45 = arith.constant 0 : index
    %c0_46 = arith.constant 0 : index
    %c0_47 = arith.constant 0 : index
    %c0_48 = arith.constant 0 : index
    %21 = vector.load %arg10[%c0_45, %c0_46, %c0_47, %c0_48] : memref<1x4x4x8xf32, #tpu.memory_space<vmem>>, vector<1x4x4x8xf32>
    %22 = vector.shape_cast %21 : vector<1x4x4x8xf32> to vector<4x4x8xf32>
    %c0_49 = arith.constant 0 : index
    %c24_50 = arith.constant 24 : index
    %c0_51 = arith.constant 0 : index
    %23 = vector.load %arg15[%c0_49, %c24_50, %c0_51] : memref<4x28x8xf32, #tpu.memory_space<vmem>>, vector<4x4x8xf32>
    tpu.vector_store %arg15[%c0_49, %c24_50, %c0_51], %22 {strides = array<i32>} : memref<4x28x8xf32, #tpu.memory_space<vmem>>, vector<4x4x8xf32>,
    %c0_52 = arith.constant 0 : index
    %c0_53 = arith.constant 0 : index
    %c0_54 = arith.constant 0 : index
    %c0_55 = arith.constant 0 : index
    %24 = vector.load %arg11[%c0_52, %c0_53, %c0_54, %c0_55] : memref<1x4x8x24xf32, #tpu.memory_space<vmem>>, vector<1x4x8x24xf32>
    %25 = vector.shape_cast %24 : vector<1x4x8x24xf32> to vector<4x8x24xf32>
    %c0_56 = arith.constant 0 : index
    %c0_57 = arith.constant 0 : index
    %c0_58 = arith.constant 0 : index
    %26 = vector.load %arg16[%c0_56, %c0_57, %c0_58] : memref<4x8x28xf32, #tpu.memory_space<vmem>>, vector<4x8x24xf32>
    tpu.vector_store %arg16[%c0_56, %c0_57, %c0_58], %25 {strides = array<i32>} : memref<4x8x28xf32, #tpu.memory_space<vmem>>, vector<4x8x24xf32>,
    %c0_59 = arith.constant 0 : index
    %c0_60 = arith.constant 0 : index
    %c0_61 = arith.constant 0 : index
    %c0_62 = arith.constant 0 : index
    %27 = vector.load %arg12[%c0_59, %c0_60, %c0_61, %c0_62] : memref<1x4x8x4xf32, #tpu.memory_space<vmem>>, vector<1x4x8x4xf32>
    %28 = vector.shape_cast %27 : vector<1x4x8x4xf32> to vector<4x8x4xf32>
    %c0_63 = arith.constant 0 : index
    %c0_64 = arith.constant 0 : index
    %c24_65 = arith.constant 24 : index
    %29 = vector.load %arg16[%c0_63, %c0_64, %c24_65] : memref<4x8x28xf32, #tpu.memory_space<vmem>>, vector<4x8x4xf32>
    tpu.vector_store %arg16[%c0_63, %c0_64, %c24_65], %28 {strides = array<i32>} : memref<4x8x28xf32, #tpu.memory_space<vmem>>, vector<4x8x4xf32>,
    %c0_66 = arith.constant 0 : index
    %c0_67 = arith.constant 0 : index
    %c0_68 = arith.constant 0 : index
    %c0_69 = arith.constant 0 : index
    %30 = vector.load %arg2[%c0_66, %c0_67, %c0_68, %c0_69] : memref<1x4x8x8xf32, #tpu.memory_space<vmem>>, vector<1x4x8x8xf32>
    %31 = vector.shape_cast %30 : vector<1x4x8x8xf32> to vector<4x8x8xf32>
    %c0_70 = arith.constant 0 : index
    %c0_71 = arith.constant 0 : index
    %c0_72 = arith.constant 0 : index
    %32 = vector.load %arg14[%c0_70, %c0_71, %c0_72] : memref<4x28x8xf32, #tpu.memory_space<vmem>>, vector<4x28x8xf32>
    "tpu.trace_start"() <{level = 10 : i32, message = "hqd,hkd->hqk"}> : () -> ()
    %cst = arith.constant dense<0.000000e+00> : vector<4x8x28xf32>
    %33 = tpu.matmul %31, %32, %cst {dimension_numbers = #tpu.dot_dimension_numbers<[2], [2], [1], [1], [0, 0, 0, 1, 1, 1], [0], [0]>} : vector<4x8x8xf32>, vector<4x28x8xf32>, vector<4x8x28xf32> -> vector<4x8x28xf32>
    "tpu.trace_stop"() : () -> ()
    %c0_73 = arith.constant 0 : index
    %c0_74 = arith.constant 0 : index
    %c0_75 = arith.constant 0 : index
    %34 = vector.load %arg16[%c0_73, %c0_74, %c0_75] : memref<4x8x28xf32, #tpu.memory_space<vmem>>, vector<4x8x28xf32>
    %35 = arith.addf %33, %34 : vector<4x8x28xf32>
    %cst_76 = arith.constant dense<0xFF800000> : vector<4x8xf32>
    %36 = vector.multi_reduction <maximumf>, %35, %cst_76 [2] : vector<4x8x28xf32> to vector<4x8xf32>
    %37 = vector.shape_cast %36 : vector<4x8xf32> to vector<4x8x1xf32>
    %38 = vector.broadcast %37 : vector<4x8x1xf32> to vector<4x8x28xf32>
    %39 = arith.subf %35, %38 : vector<4x8x28xf32>
    %40 = math.exp %39 : vector<4x8x28xf32>
    %cst_77 = arith.constant dense<0.000000e+00> : vector<4x8xf32>
    %41 = vector.multi_reduction <add>, %40, %cst_77 [2] : vector<4x8x28xf32> to vector<4x8xf32>
    %42 = vector.shape_cast %41 : vector<4x8xf32> to vector<4x8x1xf32>
    %43 = tpu.reciprocal %42 {approx = true} : vector<4x8x1xf32> -> vector<4x8x1xf32>
    %44 = vector.broadcast %43 : vector<4x8x1xf32> to vector<4x8x28xf32>
    %45 = arith.mulf %40, %44 : vector<4x8x28xf32>
    %c0_78 = arith.constant 0 : index
    %c0_79 = arith.constant 0 : index
    %c0_80 = arith.constant 0 : index
    %46 = vector.load %arg15[%c0_78, %c0_79, %c0_80] : memref<4x28x8xf32, #tpu.memory_space<vmem>>, vector<4x28x8xf32>
    "tpu.trace_start"() <{level = 10 : i32, message = "hqk,hkd->hqd"}> : () -> ()
    %cst_81 = arith.constant dense<0.000000e+00> : vector<4x8x8xf32>
    %47 = tpu.matmul %45, %46, %cst_81 {dimension_numbers = #tpu.dot_dimension_numbers<[2], [1], [1], [2], [0, 0, 0, 1, 1, 2], [0], [0]>} : vector<4x8x28xf32>, vector<4x28x8xf32>, vector<4x8x8xf32> -> vector<4x8x8xf32>
    "tpu.trace_stop"() : () -> ()
    %48 = vector.extract_strided_slice %47 {offsets = [0, 0, 0], sizes = [1, 8, 8], strides = [1, 1, 1]} : vector<4x8x8xf32> to vector<1x8x8xf32>
    %49 = vector.shape_cast %48 : vector<1x8x8xf32> to vector<8x8xf32>
    %c0_82 = arith.constant 0 : index
    %c0_83 = arith.constant 0 : index
    %c0_84 = arith.constant 0 : index
    %50 = vector.load %arg13[%c0_82, %c0_83, %c0_84] : memref<1x8x32xf32, #tpu.memory_space<vmem>>, vector<1x8x8xf32>
    %51 = vector.shape_cast %50 : vector<1x8x8xf32> to vector<8x8xf32>
    %52 = vector.shape_cast %49 : vector<8x8xf32> to vector<1x8x8xf32>
    tpu.vector_store %arg13[%c0_82, %c0_83, %c0_84], %52 {strides = array<i32>} : memref<1x8x32xf32, #tpu.memory_space<vmem>>, vector<1x8x8xf32>,
    %53 = vector.extract_strided_slice %47 {offsets = [1, 0, 0], sizes = [1, 8, 8], strides = [1, 1, 1]} : vector<4x8x8xf32> to vector<1x8x8xf32>
    %54 = vector.shape_cast %53 : vector<1x8x8xf32> to vector<8x8xf32>
    %c0_85 = arith.constant 0 : index
    %c0_86 = arith.constant 0 : index
    %c8_87 = arith.constant 8 : index
    %55 = vector.load %arg13[%c0_85, %c0_86, %c8_87] : memref<1x8x32xf32, #tpu.memory_space<vmem>>, vector<1x8x8xf32>
    %56 = vector.shape_cast %55 : vector<1x8x8xf32> to vector<8x8xf32>
    %57 = vector.shape_cast %54 : vector<8x8xf32> to vector<1x8x8xf32>
    tpu.vector_store %arg13[%c0_85, %c0_86, %c8_87], %57 {strides = array<i32>} : memref<1x8x32xf32, #tpu.memory_space<vmem>>, vector<1x8x8xf32>,
    %58 = vector.extract_strided_slice %47 {offsets = [2, 0, 0], sizes = [1, 8, 8], strides = [1, 1, 1]} : vector<4x8x8xf32> to vector<1x8x8xf32>
    %59 = vector.shape_cast %58 : vector<1x8x8xf32> to vector<8x8xf32>
    %c0_88 = arith.constant 0 : index
    %c0_89 = arith.constant 0 : index
    %c16_90 = arith.constant 16 : index
    %60 = vector.load %arg13[%c0_88, %c0_89, %c16_90] : memref<1x8x32xf32, #tpu.memory_space<vmem>>, vector<1x8x8xf32>
    %61 = vector.shape_cast %60 : vector<1x8x8xf32> to vector<8x8xf32>
    %62 = vector.shape_cast %59 : vector<8x8xf32> to vector<1x8x8xf32>
    tpu.vector_store %arg13[%c0_88, %c0_89, %c16_90], %62 {strides = array<i32>} : memref<1x8x32xf32, #tpu.memory_space<vmem>>, vector<1x8x8xf32>,
    %63 = vector.extract_strided_slice %47 {offsets = [3, 0, 0], sizes = [1, 8, 8], strides = [1, 1, 1]} : vector<4x8x8xf32> to vector<1x8x8xf32>
    %64 = vector.shape_cast %63 : vector<1x8x8xf32> to vector<8x8xf32>
    %c0_91 = arith.constant 0 : index
    %c0_92 = arith.constant 0 : index
    %c24_93 = arith.constant 24 : index
    %65 = vector.load %arg13[%c0_91, %c0_92, %c24_93] : memref<1x8x32xf32, #tpu.memory_space<vmem>>, vector<1x8x8xf32>
    %66 = vector.shape_cast %65 : vector<1x8x8xf32> to vector<8x8xf32>
    %67 = vector.shape_cast %64 : vector<8x8xf32> to vector<1x8x8xf32>
    tpu.vector_store %arg13[%c0_91, %c0_92, %c24_93], %67 {strides = array<i32>} : memref<1x8x32xf32, #tpu.memory_space<vmem>>, vector<1x8x8xf32>,
    return
  }
  func.func @transform_0(%arg0: i32, %arg1: i32) -> (i32, i32, i32, i32) {
    %c0_i32 = arith.constant 0 : i32
    %c0_i32_0 = arith.constant 0 : i32
    %c0_i32_1 = arith.constant 0 : i32
    return %arg0, %c0_i32, %arg1, %c0_i32_0 : i32, i32, i32, i32
  }
  func.func @transform_1(%arg0: i32, %arg1: i32) -> (i32, i32, i32, i32) {
    %c0_i32 = arith.constant 0 : i32
    %c0_i32_0 = arith.constant 0 : i32
    %c0_i32_1 = arith.constant 0 : i32
    return %arg0, %c0_i32, %arg1, %c0_i32_0 : i32, i32, i32, i32
  }
  func.func @transform_2(%arg0: i32, %arg1: i32) -> (i32, i32, i32, i32) {
    %c1_i32 = arith.constant 1 : i32
    %0 = arith.addi %arg1, %c1_i32 : i32
    %c0_i32 = arith.constant 0 : i32
    %c0_i32_0 = arith.constant 0 : i32
    %c0_i32_1 = arith.constant 0 : i32
    return %arg0, %c0_i32, %0, %c0_i32_0 : i32, i32, i32, i32
  }
  func.func @transform_3(%arg0: i32, %arg1: i32) -> (i32, i32, i32, i32) {
    %c2_i32 = arith.constant 2 : i32
    %0 = arith.addi %arg1, %c2_i32 : i32
    %c0_i32 = arith.constant 0 : i32
    %c0_i32_0 = arith.constant 0 : i32
    %c0_i32_1 = arith.constant 0 : i32
    return %arg0, %c0_i32, %0, %c0_i32_0 : i32, i32, i32, i32
  }
  func.func @transform_4(%arg0: i32, %arg1: i32) -> (i32, i32, i32, i32) {
    %c0_i32 = arith.constant 0 : i32
    %c0_i32_0 = arith.constant 0 : i32
    %c0_i32_1 = arith.constant 0 : i32
    return %arg0, %c0_i32, %arg1, %c0_i32_0 : i32, i32, i32, i32
  }
  func.func @transform_5(%arg0: i32, %arg1: i32) -> (i32, i32, i32, i32) {
    %c1_i32 = arith.constant 1 : i32
    %0 = arith.addi %arg1, %c1_i32 : i32
    %c0_i32 = arith.constant 0 : i32
    %c0_i32_0 = arith.constant 0 : i32
    %c0_i32_1 = arith.constant 0 : i32
    return %arg0, %c0_i32, %0, %c0_i32_0 : i32, i32, i32, i32
  }
  func.func @transform_6(%arg0: i32, %arg1: i32) -> (i32, i32, i32, i32) {
    %c2_i32 = arith.constant 2 : i32
    %0 = arith.addi %arg1, %c2_i32 : i32
    %c0_i32 = arith.constant 0 : i32
    %c0_i32_0 = arith.constant 0 : i32
    %c0_i32_1 = arith.constant 0 : i32
    return %arg0, %c0_i32, %0, %c0_i32_0 : i32, i32, i32, i32
  }
  func.func @transform_7(%arg0: i32, %arg1: i32) -> (i32, i32, i32, i32) {
    %c0_i32 = arith.constant 0 : i32
    %c0_i32_0 = arith.constant 0 : i32
    %c0_i32_1 = arith.constant 0 : i32
    %c0_i32_2 = arith.constant 0 : i32
    return %arg0, %c0_i32, %c0_i32_0, %c0_i32_1 : i32, i32, i32, i32
  }
  func.func @transform_8(%arg0: i32, %arg1: i32) -> (i32, i32, i32, i32) {
    %c0_i32 = arith.constant 0 : i32
    %c0_i32_0 = arith.constant 0 : i32
    %c0_i32_1 = arith.constant 0 : i32
    %c0_i32_2 = arith.constant 0 : i32
    return %arg0, %c0_i32, %c0_i32_0, %c0_i32_1 : i32, i32, i32, i32
  }
  func.func @transform_9(%arg0: i32, %arg1: i32) -> (i32, i32, i32, i32) {
    %c0_i32 = arith.constant 0 : i32
    %c0_i32_0 = arith.constant 0 : i32
    %c0_i32_1 = arith.constant 0 : i32
    %c0_i32_2 = arith.constant 0 : i32
    %c0_i32_3 = arith.constant 0 : i32
    return %c0_i32, %c0_i32_0, %c0_i32_1, %c0_i32_2 : i32, i32, i32, i32
  }
  func.func @transform_10(%arg0: i32, %arg1: i32) -> (i32, i32, i32, i32) {
    %c0_i32 = arith.constant 0 : i32
    %c0_i32_0 = arith.constant 0 : i32
    %c0_i32_1 = arith.constant 0 : i32
    return %arg0, %c0_i32, %arg1, %c0_i32_0 : i32, i32, i32, i32
  }
  func.func @transform_11(%arg0: i32, %arg1: i32) -> (i32, i32, i32) {
    %c0_i32 = arith.constant 0 : i32
    %c0_i32_0 = arith.constant 0 : i32
    return %arg0, %arg1, %c0_i32 : i32, i32, i32
  }
}

module attributes {stable_mosaic.version = 11 : i64} {
  func.func @_linear_kernel(%arg0: i32, %arg1: memref<32x32xf32, #tpu.memory_space<vmem>>, %arg2: memref<32x32xf32, #tpu.memory_space<vmem>>, %arg3: memref<32x32xf32, #tpu.memory_space<vmem>>) attributes {dimension_semantics = [#tpu.dimension_semantics<parallel>], iteration_bounds = array<i64: 1>, scalar_prefetch = 0 : i64, scratch_operands = 0 : i64, tpu.core_type = #tpu.core_type<tc>, window_params = [{transform_indices = @transform_0, window_bounds = array<i64: 32, 32>}, {pipeline_mode = #tpu.pipeline_mode<synchronous>, transform_indices = @transform_1, window_bounds = array<i64: 32, 32>}, {transform_indices = @transform_2, window_bounds = array<i64: 32, 32>}]} {
    %c0 = arith.constant 0 : index
    %c0_0 = arith.constant 0 : index
    %0 = vector.load %arg1[%c0, %c0_0] : memref<32x32xf32, #tpu.memory_space<vmem>>, vector<32x32xf32>
    %c0_1 = arith.constant 0 : index
    %c0_2 = arith.constant 0 : index
    %1 = vector.load %arg2[%c0_1, %c0_2] : memref<32x32xf32, #tpu.memory_space<vmem>>, vector<32x32xf32>
    %cst = arith.constant dense<0.000000e+00> : vector<32x32xf32>
    %2 = tpu.matmul %0, %1, %cst {dimension_numbers = #tpu.dot_dimension_numbers<[1], [0], [0], [1], [0, 0, 1, 1], [], []>} : vector<32x32xf32>, vector<32x32xf32>, vector<32x32xf32> -> vector<32x32xf32>
    %c0_3 = arith.constant 0 : index
    %c0_4 = arith.constant 0 : index
    %3 = vector.load %arg3[%c0_3, %c0_4] : memref<32x32xf32, #tpu.memory_space<vmem>>, vector<32x32xf32>
    tpu.vector_store %arg3[%c0_3, %c0_4], %2 {strides = array<i32>} : memref<32x32xf32, #tpu.memory_space<vmem>>, vector<32x32xf32>,
    return
  }
  func.func @transform_0(%arg0: i32) -> (i32, i32) {
    %c0_i32 = arith.constant 0 : i32
    %c0_i32_0 = arith.constant 0 : i32
    return %arg0, %c0_i32 : i32, i32
  }
  func.func @transform_1(%arg0: i32) -> (i32, i32) {
    %c0_i32 = arith.constant 0 : i32
    %c0_i32_0 = arith.constant 0 : i32
    %c0_i32_1 = arith.constant 0 : i32
    return %c0_i32, %c0_i32_0 : i32, i32
  }
  func.func @transform_2(%arg0: i32) -> (i32, i32) {
    %c0_i32 = arith.constant 0 : i32
    %c0_i32_0 = arith.constant 0 : i32
    return %arg0, %c0_i32 : i32, i32
  }
}

</mosaic_0001>

<bundles_post_ra>
// kernel: _lambda_.3
= control target key start
LH: loop header
LB: loop body
LE: loop exit
PB: predicated region body
PF: predicated region fallthrough
CT: control target
= control target key end

     0   :  { %v183_v0 = vmov 0.0   ;;  %vm20_vm0 = vcmask 261120   ;;  %vm184_vm1 = vmmov 0   ;;  %vm126_vm2 = vcmask 785408   ;;  %s247_s1 = inlined_call_operand.vmem [shape: f32[32,96], index: 1, kind: input, shape index: {}]   ;;  %s248_s0 = inlined_call_operand.vmem [shape: f32[40,32], index: 0, kind: input, shape index: {}]   ;;  %s249_s2 = inlined_call_operand.vmem [shape: f32[40,96], index: 2, kind: output, shape index: {}]  }
   0x1   :  { %150 = vmatprep.subr.mxu0 %v183_v0  ;;  %v19_v1 = vld [vmem:[%s247_s1 + $0x18] sm:$0xff]  ;;  %173 = vmatprep.subr.mxu1 %v183_v0  ;;  %v18_v2 = vld [vmem:[%s247_s1 + $0x10] sm:$0xff]  ;;  %v17_v3 = vld [vmem:[%s247_s1 + $0x8] sm:$0xff] }
   0x2   :  { %151 = vmatpush3.msra.mxu0 %v19_v1  ;;  %177 = vmatpush3.msra.mxu1 %v19_v1  ;;  %v16_v4 = vld [vmem:[%s247_s1] sm:$0xff]  ;;  %v14_v6 = vld [vmem:[%s248_s0 + $0x18] sm:$0xff]  ;;  %v12_v7 = vld [vmem:[%s248_s0 + $0x8] sm:$0xff] }
   0x3   :  { %152 = vmatprep.subr.mxu0 %v183_v0  ;;  %174 = vmatprep.subr.mxu1 %v183_v0  ;;  %v11_v5 = vld [vmem:[%s248_s0] sm:$0xff]  ;;  %v13_v9 = vld [vmem:[%s248_s0 + $0x10] sm:$0xff] }
   0x4   :  { %153 = vmatpush3.msra.mxu0 %v18_v2  ;;  %178 = vmatpush3.msra.mxu1 %v18_v2  ;;  %v15_v8 = vld [vmem:[%s248_s0 + $0x20] sm:$0xff] }
   0x5   :  { %154 = vmatprep.subr.mxu0 %v183_v0  ;;  %175 = vmatprep.subr.mxu1 %v183_v0 }
   0x6   :  { %155 = vmatpush3.msra.mxu0 %v17_v3  ;;  %179 = vmatpush3.msra.mxu1 %v17_v3 }
   0x7   :  { %156 = vmatprep.subr.mxu0 %v183_v0  ;;  %158 = vmatprep.mubr.msk.f32.mxu0 %vm184_vm1, %v183_v0 }
   0x8   :  { %157 = vmatpush3.msra.mxu0 %v16_v4  ;;  %176 = vmatprep.subr.mxu1 %v183_v0 }
   0x9   :  { %159 = vmatmul.mubr.msk.f32.vlgmr.msra.gmra.mxu0 %vm20_vm0, %v11_v5  ;;  %180 = vmatpush3.msra.mxu1 %v16_v4 }
   0xa   :  { %167 = vmatprep.mubr.msk.f32.mxu1 %vm184_vm1, %v183_v0  ;;  %161 = vmatprep.mubr.msk.f32.mxu0 %vm184_vm1, %v183_v0 }
   0xb   :  { %168 = vmatmul.mubr.msk.f32.vlgmr.msra.gmra.mxu1 %vm20_vm0, %v14_v6 }
   0xc   :  { %170 = vmatprep.mubr.msk.f32.mxu1 %vm184_vm1, %v183_v0 }
   0xd   :  { %162 = vmatmul.mubr.msk.f32.gmra.mxu0 %vm20_vm0, %v12_v7 }
   0xe   :  { %164 = vmatprep.mubr.msk.f32.mxu0 %vm184_vm1, %v183_v0 }
   0xf   :  { %171 = vmatmul.mubr.msk.f32.gmra.mxu1 %vm20_vm0, %v15_v8 }
  0x11   :  { %165 = vmatmul.mubr.msk.f32.gmra.mxu0 %vm20_vm0, %v13_v9 }
  0xc9   :  { %v102_v10 = vpop.f32.mrf.mxu0 }
  0xca   :  { %127 = vst.msk [vmem:[%s249_s2] sm:$0xff] %vm126_vm2, %v102_v10 }
  0xcb   :  { %v160_v11 = vpop.f32.mrf.mxu0  ;;  %v117_v12 = vpop.f32.mrf.mxu1 }
  0xcc   :  { %130 = vst.msk [vmem:[%s249_s2 + $0x18] sm:$0xff] %vm126_vm2, %v117_v12 }
  0xcd   :  { %v107_v13 = vpop.f32.mrf.mxu0  ;;  %v169_v14 = vpop.f32.mrf.mxu1 }
  0xce   :  { %128 = vst.msk [vmem:[%s249_s2 + $0x8] sm:$0xff] %vm126_vm2, %v107_v13 }
  0xcf   :  { %v163_v15 = vpop.f32.mrf.mxu0  ;;  %v122_v16 = vpop.f32.mrf.mxu1 }
  0xd0   :  { %131 = vst.msk [vmem:[%s249_s2 + $0x20] sm:$0xff] %vm126_vm2, %v122_v16 }
  0xd1   :  { %v112_v17 = vpop.f32.mrf.mxu0  ;;  %v172_v18 = vpop.f32.mrf.mxu1 }
  0xd2   :  { %129 = vst.msk [vmem:[%s249_s2 + $0x10] sm:$0xff] %vm126_vm2, %v112_v17 }
  0xd3   :  { %v166_v19 = vpop.f32.mrf.mxu0 }

// kernel: _lambda_.5
= control target key start
LH: loop header
LB: loop body
LE: loop exit
PB: predicated region body
PF: predicated region fallthrough
CT: control target
= control target key end

     0   :  { %s250_s0 = inlined_call_operand.vmem [shape: f32[32,32], index: 0, kind: input, shape index: {}]   ;;  %s251_s1 = inlined_call_operand.vmem [shape: f32[32,32], index: 1, kind: input, shape index: {}]   ;;  %s252_s2 = inlined_call_operand.hbm [shape: f32[32,32], index: 2, kind: output, shape index: {}]  }
   0x1   :  { %v19_v0 = vld [vmem:[%s251_s1 + $0x18] sm:$0xff]  ;;  %v18_v1 = vld [vmem:[%s251_s1 + $0x10] sm:$0xff]  ;;  %v17_v2 = vld [vmem:[%s251_s1 + $0x8] sm:$0xff] }
   0x2   :  { %150 = vmatprep.subr.mxu0 %v19_v0  ;;  %164 = vmatprep.subr.mxu1 %v19_v0 }
   0x3   :  { %151 = vmatpush3.msra.mxu0 %v19_v0  ;;  %168 = vmatpush3.msra.mxu1 %v19_v0 }
   0x4   :  { %7 = vsyncpa [#allocation3], 0  ;;  %152 = vmatprep.subr.mxu0 %v18_v1  ;;  %165 = vmatprep.subr.mxu1 %v18_v1  ;;  %v16_v3 = vld [vmem:[%s251_s1] sm:$0xff]  ;;  %vm20_vm0 = vcmask 261120   ;;  %v14_v5 = vld [vmem:[%s250_s0 + $0x10] sm:$0xff]  ;;  %s197_s24 = smov [#allocation2]  }
   0x5   :  { %153 = vmatpush3.msra.mxu0 %v18_v1  ;;  %169 = vmatpush3.msra.mxu1 %v18_v1  ;;  %v12_v4 = vld [vmem:[%s250_s0] sm:$0xff]  ;;  %v13_v6 = vld [vmem:[%s250_s0 + $0x8] sm:$0xff]  ;;  %v15_v7 = vld [vmem:[%s250_s0 + $0x18] sm:$0xff]  ;;  %s127_s25 = sshll.u32 %s197_s24, 4  ;;  %s128_s25 = int_to_ptr.vmem [resolvable:$true] %s127_s25 }
   0x6   :  { %154 = vmatprep.subr.mxu0 %v17_v2  ;;  %166 = vmatprep.subr.mxu1 %v17_v2  ;;  %s175_s0 = scalar_lea.vmem %s128_s25, 512  ;;  %p180_p1 = scmp.lt.s32.totalorder %s128_s25, %s128_s25 }
   0x7   :  { %155 = vmatpush3.msra.mxu0 %v17_v2  ;;  %170 = vmatpush3.msra.mxu1 %v17_v2  ;;  %p176_p0 = scmp.ne.s32.totalorder %s128_s25, %s175_s0  ;;  %p181_p2 = scmp.lt.s32.totalorder %s175_s0, %s175_s0 }
   0x8   :  { %156 = vmatprep.subr.mxu0 %v16_v3  ;;  %167 = vmatprep.subr.mxu1 %v16_v3 }
   0x9   :  { %157 = vmatpush3.msra.mxu0 %v16_v3  ;;  %171 = vmatpush3.msra.mxu1 %v16_v3  ;;  %p182_p3 = por %p181_p2, %p180_p1 }
   0xa   :  { %158 = vmatprep.mubr.msk.f32.mxu0 %vm20_vm0, %v12_v4  ;;  %161 = vmatprep.mubr.msk.f32.mxu1 %vm20_vm0, %v14_v5 }
   0xb   :  { %159 = vmatmul.mubr.msk.f32.vlgmr.msra.gmra.mxu0 %vm20_vm0, %v13_v6  ;;  %162 = vmatmul.mubr.msk.f32.vlgmr.msra.gmra.mxu1 %vm20_vm0, %v15_v7  ;;  %p183_p4 = pnand %p182_p3, %p176_p0 }
  0xcb   :  { %v160_v8 = vpop.f32.mrf.mxu0  ;;  %v163_v9 = vpop.f32.mrf.mxu1 }
  0xcc   :  { %119 = vst.msk [vmem:[#allocation2 + $0x8] sm:$0xff] %vm20_vm0, %v160_v8  ;;  %121 = vst.msk [vmem:[#allocation2 + $0x18] sm:$0xff] %vm20_vm0, %v163_v9 }
  0xcd   :  { %v99_v10 = vpop.f32.mrf.mxu0  ;;  %v109_v11 = vpop.f32.mrf.mxu1 }
  0xce   :  { %118 = vst.msk [vmem:[#allocation2] sm:$0xff] %vm20_vm0, %v99_v10  ;;  %120 = vst.msk [vmem:[#allocation2 + $0x10] sm:$0xff] %vm20_vm0, %v109_v11 }
  0xcf   :  { %186 = shalt.err (!%p183_p4)
}
  0xd0   :  { %s198_s26 = smov 128   ;;  %s199_s27 = smov 8  }
  0xd1   :  { %133 = dma.vmem_to_hbm [thread:$0]  %s128_s25, 512, %s252_s2, [#allocation3], %s198_s26, %s198_s26, %s199_s27  }
  0xd2   :  { %195 = dma.done.wait [#allocation3], 512  }
  0xd3   :  { %196 = vsyncadd [#allocation3], 4294966784 }
  0xd4   :  { %137 = vsyncpa [#allocation3], 1 }

// kernel: _lambda_.4
= control target key start
LH: loop header
LB: loop body
LE: loop exit
PB: predicated region body
PF: predicated region fallthrough
CT: control target
= control target key end

     0   :  { %s3025_s0 = inlined_call_operand.vmem [shape: f32[2,4,16,8], index: 0, kind: input, shape index: {}]   ;;  %s3026_s1 = inlined_call_operand.vmem [shape: f32[2,4,32,8], index: 1, kind: input, shape index: {}, may-alias: {1,2,3}]   ;;  %s3027_s2 = inlined_call_operand.vmem [shape: f32[2,4,32,8], index: 2, kind: input, shape index: {}, may-alias: {1,2,3}]   ;;  %s3028_s3 = inlined_call_operand.vmem [shape: f32[2,4,32,8], index: 3, kind: input, shape index: {}, may-alias: {1,2,3}]   ;;  %s3029_s4 = inlined_call_operand.vmem [shape: f32[2,4,32,8], index: 4, kind: input, shape index: {}, may-alias: {4,5,6}]   ;;  %s3030_s5 = inlined_call_operand.vmem [shape: f32[2,4,32,8], index: 5, kind: input, shape index: {}, may-alias: {4,5,6}]   ;;  %s3031_s6 = inlined_call_operand.vmem [shape: f32[2,4,32,8], index: 6, kind: input, shape index: {}, may-alias: {4,5,6}]   ;;  %s3032_s7 = inlined_call_operand.vmem [shape: f32[2,4,4,8], index: 7, kind: input, shape index: {}]   ;;  %s3033_s8 = inlined_call_operand.vmem [shape: f32[2,4,4,8], index: 8, kind: input, shape index: {}]   ;;  %s3034_s9 = inlined_call_operand.vmem [shape: f32[1,4,8,24], index: 9, kind: input, shape index: {}]   ;;  %s3035_s10 = inlined_call_operand.vmem [shape: f32[2,4,16,4], index: 10, kind: input, shape index: {}]   ;;  %s3036_s11 = inlined_call_operand.vmem [shape: f32[2,16,32], index: 11, kind: output, shape index: {}]  }
   0x1   :  { %3043 = sst [smem:[#allocation18_spill]] %s3031_s6 }
   0x2   :  { %3044 = sst [smem:[#allocation19_spill]] %s3032_s7 }
   0x3   :  { %3045 = sst [smem:[#allocation20_spill]] %s3033_s8 }
   0x4   :  { %3046 = sst [smem:[#allocation21_spill]] %s3034_s9 }
   0x5   :  { %3047 = sst [smem:[#allocation22_spill]] %s3035_s10 }
   0x6   :  { %3048 = sst [smem:[#allocation23_spill]] %s3036_s11 }
   0x7   :  { %s2597_s17 = smov 0   ;;  %s2599_s18 = smov 0  }
   0x8   :  { %s2601_s19 = smov 0   ;;  %s2603_s20 = smov 0  }
   0x9   :  { %s2605_s21 = smov 0   ;;  %s2607_s22 = smov 0  }
   0xa   :  { %s2609_s23 = smov 0   ;;  %s2611_s24 = smov 0  }
   0xb   :  { %s2613_s25 = smov 0   ;;  %s2615_s26 = smov 0  }
   0xc   :  { %s2617_s27 = smov 0  }
   0xd LB: > { %3049 = sst [smem:[#allocation13_spill]] %s2498_s19  ;;  %s30_s28 = sadd.s32 1, %s2522_s25  ;;  %s2530_s27 = sphi %s2617_s27, %s21_s27   ;;  %s2526_s26 = sphi %s2615_s26, %s3077_s26   ;;  %s2522_s25 = sphi %s2613_s25, %s3076_s25   ;;  %s2518_s24 = sphi %s2611_s24, %s3075_s24   ;;  %s2514_s23 = sphi %s2609_s23, %s3074_s23   ;;  %s2510_s22 = sphi %s2607_s22, %s3073_s22   ;;  %s2506_s21 = sphi %s2605_s21, %s3072_s21   ;;  %s2502_s20 = sphi %s2603_s20, %s3071_s20   ;;  %s2498_s19 = sphi %s2601_s19, %s3070_s19   ;;  %s2494_s18 = sphi %s2599_s18, %s3069_s18   ;;  %s2490_s17 = sphi %s2597_s17, %s3068_s17  }
   0xe   : > { %3050 = sst [smem:[#allocation14_spill]] %s2506_s21  ;;  %s33_s29 = sadd.s32 1, %s2526_s26 }
   0xf   : > { %3051 = sst [smem:[#allocation15_spill]] %s2514_s23  ;;  %p31_p0 = scmp.ge.s32.totalorder %s30_s28, 2 }
  0x10   : > { %3052 = sst [smem:[#allocation16_spill]] %s2518_s24  ;;  %s42_s30 = sadd.s32 1, %s2510_s22 }
  0x11   : > { %p49_p1 = scmp.ne.s32.totalorder %s2510_s22, %s2506_s21  ;;  %p50_p2 = scmp.eq.s32.totalorder %s2530_s27, 0 }
  0x12   : > { %s2658_s12 = scalar_select %p31_p0, 0, %s30_s28  }
  0x13   : > { %s3079_s29 = smov (!%p31_p0, %s33_s29), %s2526_s26  ;;  %p2665_p3 = por %p50_p2, %p49_p1 }
  0x14   : > { %s38_s13 = ssub.s32 %s2522_s25, %s2658_s12  ;;  %p35_p4 = scmp.ge.s32.totalorder %s3079_s29, 2 }
  0x15   : > { %s94_s15 = sadd.s32 1, %s2658_s12  ;;  %s100_s11 = sadd.s32 1, %s2502_s20 }
  0x16   : > { %s96_s16 = ssub.s32 %s30_s28, %s94_s15  ;;  %s3081_s29 = smov (%p35_p4, %s3079_s29), 0 }
  0x17   : > { %3054 = sst [smem:[#allocation17_spill]] %s3081_s29  ;;  %p107_p5 = scmp.ne.s32.totalorder %s2502_s20, %s2498_s19 }
  0x18   : > { %s123_s23 = sadd.s32 2, %s2522_s25  ;;  %s37_s8 = ssub.s32 %s2526_s26, %s3081_s29 }
  0x19   : > { %s124_s7 = sadd.s32 2, %s2658_s12  ;;  %s39_s21 = sor.u32 %s38_s13, %s37_s8 }
  0x1a   : > { %s97_s9 = sor.u32 %s96_s16, %s37_s8  ;;  %p40_p6 = scmp.eq.s32.totalorder %s39_s21, 0 }
  0x1b   : > { %p98_p7 = scmp.eq.s32.totalorder %s97_s9, 0  ;;  %p2681_p8 = por %p107_p5, %p50_p2 }
  0x1c   : > { %s126_s15 = ssub.s32 %s123_s23, %s124_s7  ;;  %s130_s6 = sadd.s32 1, %s2494_s18 }
  0x1d   : > { %s2686_s24 = scalar_select %p40_p6, %s2510_s22, %s42_s30  }
  0x1e   : > { %s2689_s10 = scalar_select %p98_p7, %s2502_s20, %s100_s11  }
  0x1f   : > { %s127_s19 = sor.u32 %s126_s15, %s37_s8  ;;  %p137_p10 = scmp.ne.s32.totalorder %s2494_s18, %s2490_s17 }
  0x20   : > { %p128_p9 = scmp.eq.s32.totalorder %s127_s19, 0  ;;  %p2119_p12 = scmp.ge.s32.totalorder %s2530_s27, 4 }
  0x21   : > { %p2699_p11 = por %p137_p10, %p50_p2 }
  0x22   : > { %s2695_s29 = scalar_select %p128_p9, %s2494_s18, %s130_s6  }
  0x23   : > { %383 = sbr.rel (%p2119_p12) target bundleno = 124 (0x7c), region = 20 }
  0x28   : > { %386 = sbr.rel (!%p2665_p3) target bundleno = 48 (0x30), region = 24  ;;  %s388_s7 = sand.u32 (%p2665_p3), 1, %s2510_s22  }
  0x29   : > { %s2121_s8 = sshll.u32 (%p2665_p3), %s2526_s26, 3  ;;  %s2120_s9 = sshll.u32 (%p2665_p3), %s388_s7, 5 }
  0x2a   : > { %s392_s11 = sadd.s32 (%p2665_p3), %s2522_s25, %s2121_s8  ;;  %s390_s13 = scalar_lea.vmem (%p2665_p3), [#allocation5], %s2120_s9 }
  0x2b   : > { %s2122_s6 = sshll.u32 (%p2665_p3), %s392_s11, 3 }
  0x2c   : > { %s394_s30 = scalar_lea.vmem (%p2665_p3), %s3025_s0, %s2122_s6 }
  0x2d   : > { %v429_v0 = vld [vmem:[%s394_s30] sm:$0xff]  ;;  %v431_v1 = vld [vmem:[%s394_s30 + $0x10] sm:$0xff] }
  0x2e   : > { %v433_v2 = vld [vmem:[%s394_s30 + $0x20] sm:$0xff]  ;;  %430 = vst [vmem:[%s390_s13] sm:$0xff] %v429_v0  ;;  %432 = vst [vmem:[%s390_s13 + $0x8] sm:$0xff] %v431_v1  ;;  %v435_v3 = vld [vmem:[%s394_s30 + $0x30] sm:$0xff] }
  0x2f   : > { %434 = vst [vmem:[%s390_s13 + $0x10] sm:$0xff] %v433_v2  ;;  %436 = vst [vmem:[%s390_s13 + $0x18] sm:$0xff] %v435_v3 }
  0x30 PF: > { %442 = sbr.rel (!%p2665_p3) target bundleno = 58 (0x3a), region = 62  ;;  %s444_s16 = sand.u32 (%p2665_p3), 1, %s2510_s22  }
  0x31   : > { %s2124_s15 = sshll.u32 (%p2665_p3), %s2526_s26, 4  ;;  %s2123_s7 = sshll.u32 (%p2665_p3), %s444_s16, 5 }
  0x32   : > { %s448_s8 = sadd.s32 (%p2665_p3), %s2522_s25, %s2124_s15  ;;  %s446_s23 = scalar_lea.vmem (%p2665_p3), [#allocation6], %s2123_s7 }
  0x33   : > { %s2125_s11 = sshll.u32 (%p2665_p3), %s448_s8, 3 }
  0x34   : > { %s450_s9 = scalar_lea.vmem (%p2665_p3), %s3026_s1, %s2125_s11 }
  0x35   : > { %v485_v4 = vld [vmem:[%s450_s9] sm:$0xff] }
  0x36   : > { %v487_v5 = vld [vmem:[%s450_s9 + $0x20] sm:$0xff]  ;;  %486 = vst [vmem:[%s446_s23] sm:$0xff] %v485_v4 }
  0x37   : > { %v489_v6 = vld [vmem:[%s450_s9 + $0x40] sm:$0xff]  ;;  %488 = vst [vmem:[%s446_s23 + $0x8] sm:$0xff] %v487_v5 }
  0x38   : > { %490 = vst [vmem:[%s446_s23 + $0x10] sm:$0xff] %v489_v6  ;;  %v491_v7 = vld [vmem:[%s450_s9 + $0x60] sm:$0xff] }
  0x39   : > { %492 = vst [vmem:[%s446_s23 + $0x18] sm:$0xff] %v491_v7 }
  0x3a PF: > { %498 = sbr.rel (!%p2681_p8) target bundleno = 68 (0x44), region = 100  ;;  %s500_s30 = sand.u32 (%p2681_p8), 1, %s2502_s20  }
  0x3b   : > { %s2127_s13 = sshll.u32 (%p2681_p8), %s2526_s26, 4  ;;  %s2126_s16 = sshll.u32 (%p2681_p8), %s500_s30, 5 }
  0x3c   : > { %s1902_s15 = sadd.s32 (%p2681_p8), %s2522_s25, %s2127_s13  ;;  %s502_s19 = scalar_lea.vmem (%p2681_p8), [#allocation7], %s2126_s16 }
  0x3d   : > { %s2128_s8 = sshll.u32 (%p2681_p8), %s1902_s15, 3 }
  0x3e   : > { %s1904_s7 = scalar_lea.vmem (%p2681_p8), %s3027_s2, %s2128_s8 }
  0x3f   : > { %v2129_v8 = vld [vmem:[%s1904_s7 + $0x8] sm:$0xff] }
  0x40   : > { %v2130_v9 = vld [vmem:[%s1904_s7 + $0x28] sm:$0xff]  ;;  %543 = vst [vmem:[%s502_s19] sm:$0xff] %v2129_v8 }
  0x41   : > { %v2131_v10 = vld [vmem:[%s1904_s7 + $0x48] sm:$0xff]  ;;  %545 = vst [vmem:[%s502_s19 + $0x8] sm:$0xff] %v2130_v9 }
  0x42   : > { %547 = vst [vmem:[%s502_s19 + $0x10] sm:$0xff] %v2131_v10  ;;  %v2132_v11 = vld [vmem:[%s1904_s7 + $0x68] sm:$0xff] }
  0x43   : > { %549 = vst [vmem:[%s502_s19 + $0x18] sm:$0xff] %v2132_v11 }
  0x44 PF: > { %555 = sbr.rel (!%p2699_p11) target bundleno = 78 (0x4e), region = 138  ;;  %s557_s9 = sand.u32 (%p2699_p11), 1, %s2494_s18  }
  0x45   : > { %s2134_s23 = sshll.u32 (%p2699_p11), %s2526_s26, 4  ;;  %s2133_s30 = sshll.u32 (%p2699_p11), %s557_s9, 5 }
  0x46   : > { %s1909_s13 = sadd.s32 (%p2699_p11), %s2522_s25, %s2134_s23  ;;  %s559_s6 = scalar_lea.vmem (%p2699_p11), [#allocation8], %s2133_s30 }
  0x47   : > { %s2135_s15 = sshll.u32 (%p2699_p11), %s1909_s13, 3 }
  0x48   : > { %s1911_s16 = scalar_lea.vmem (%p2699_p11), %s3028_s3, %s2135_s15 }
  0x49   : > { %v2136_v12 = vld [vmem:[%s1911_s16 + $0x10] sm:$0xff] }
  0x4a   : > { %v2137_v13 = vld [vmem:[%s1911_s16 + $0x30] sm:$0xff]  ;;  %600 = vst [vmem:[%s559_s6] sm:$0xff] %v2136_v12 }
  0x4b   : > { %v2138_v14 = vld [vmem:[%s1911_s16 + $0x50] sm:$0xff]  ;;  %602 = vst [vmem:[%s559_s6 + $0x8] sm:$0xff] %v2137_v13 }
  0x4c   : > { %604 = vst [vmem:[%s559_s6 + $0x10] sm:$0xff] %v2138_v14  ;;  %v2139_v15 = vld [vmem:[%s1911_s16 + $0x70] sm:$0xff] }
  0x4d   : > { %606 = vst [vmem:[%s559_s6 + $0x18] sm:$0xff] %v2139_v15 }
  0x4e PF: > { %612 = sbr.rel (!%p2665_p3) target bundleno = 88 (0x58), region = 176  ;;  %s614_s7 = sand.u32 (%p2665_p3), 1, %s2510_s22  }
  0x4f   : > { %s2141_s19 = sshll.u32 (%p2665_p3), %s2526_s26, 4  ;;  %s2140_s9 = sshll.u32 (%p2665_p3), %s614_s7, 5 }
  0x50   : > { %s618_s23 = sadd.s32 (%p2665_p3), %s2522_s25, %s2141_s19  ;;  %s616_s11 = scalar_lea.vmem (%p2665_p3), [#allocation9], %s2140_s9 }
  0x51   : > { %s2142_s13 = sshll.u32 (%p2665_p3), %s618_s23, 3 }
  0x52   : > { %s620_s30 = scalar_lea.vmem (%p2665_p3), %s3029_s4, %s2142_s13 }
  0x53   : > { %v655_v16 = vld [vmem:[%s620_s30] sm:$0xff] }
  0x54   : > { %v657_v17 = vld [vmem:[%s620_s30 + $0x20] sm:$0xff]  ;;  %656 = vst [vmem:[%s616_s11] sm:$0xff] %v655_v16 }
  0x55   : > { %v659_v18 = vld [vmem:[%s620_s30 + $0x40] sm:$0xff]  ;;  %658 = vst [vmem:[%s616_s11 + $0x8] sm:$0xff] %v657_v17 }
  0x56   : > { %660 = vst [vmem:[%s616_s11 + $0x10] sm:$0xff] %v659_v18  ;;  %v661_v19 = vld [vmem:[%s620_s30 + $0x60] sm:$0xff] }
  0x57   : > { %662 = vst [vmem:[%s616_s11 + $0x18] sm:$0xff] %v661_v19 }
  0x58 PF: > { %668 = sbr.rel (!%p2681_p8) target bundleno = 98 (0x62), region = 214  ;;  %s670_s16 = sand.u32 (%p2681_p8), 1, %s2502_s20  }
  0x59   : > { %s2144_s6 = sshll.u32 (%p2681_p8), %s2526_s26, 4  ;;  %s2143_s7 = sshll.u32 (%p2681_p8), %s670_s16, 5 }
  0x5a   : > { %s1922_s19 = sadd.s32 (%p2681_p8), %s2522_s25, %s2144_s6  ;;  %s672_s8 = scalar_lea.vmem (%p2681_p8), [#allocation10], %s2143_s7 }
  0x5b   : > { %s2145_s23 = sshll.u32 (%p2681_p8), %s1922_s19, 3 }
  0x5c   : > { %s1924_s9 = scalar_lea.vmem (%p2681_p8), %s3030_s5, %s2145_s23 }
  0x5d   : > { %v2146_v20 = vld [vmem:[%s1924_s9 + $0x8] sm:$0xff] }
  0x5e   : > { %v2147_v21 = vld [vmem:[%s1924_s9 + $0x28] sm:$0xff]  ;;  %713 = vst [vmem:[%s672_s8] sm:$0xff] %v2146_v20 }
  0x5f   : > { %v2148_v22 = vld [vmem:[%s1924_s9 + $0x48] sm:$0xff]  ;;  %715 = vst [vmem:[%s672_s8 + $0x8] sm:$0xff] %v2147_v21 }
  0x60   : > { %717 = vst [vmem:[%s672_s8 + $0x10] sm:$0xff] %v2148_v22  ;;  %v2149_v23 = vld [vmem:[%s1924_s9 + $0x68] sm:$0xff] }
  0x61   : > { %719 = vst [vmem:[%s672_s8 + $0x18] sm:$0xff] %v2149_v23 }
  0x62 PF: > { %725 = sbr.rel (!%p2699_p11) target bundleno = 112 (0x70), region = 252  ;;  %s727_s28 = sand.u32 (%p2699_p11), 1, %s2494_s18  }
  0x63   : > { %s2151_s30 = sshll.u32 (%p2699_p11), %s2526_s26, 4  ;;  %s2150_s11 = sshll.u32 (%p2699_p11), %s727_s28, 5 }
  0x64   : > { %s1929_s16 = sadd.s32 (%p2699_p11), %s2522_s25, %s2151_s30  ;;  %s3057_s7 = sld [smem:[#allocation18_spill]] (%p2699_p11) }
  0x65   : > { %s2152_s6 = sshll.u32 (%p2699_p11), %s1929_s16, 3  ;;  %s729_s15 = scalar_lea.vmem (%p2699_p11), [#allocation11], %s2150_s11 }
  0x6a   : > { %s1931_s13 = scalar_lea.vmem %s3057_s7, %s2152_s6 }
  0x6b   : > { %v2153_v24 = vld [vmem:[%s1931_s13 + $0x10] sm:$0xff] }
  0x6c   : > { %v2154_v25 = vld [vmem:[%s1931_s13 + $0x30] sm:$0xff]  ;;  %770 = vst [vmem:[%s729_s15] sm:$0xff] %v2153_v24 }
  0x6d   : > { %v2155_v26 = vld [vmem:[%s1931_s13 + $0x50] sm:$0xff]  ;;  %772 = vst [vmem:[%s729_s15 + $0x8] sm:$0xff] %v2154_v25 }
  0x6e   : > { %774 = vst [vmem:[%s729_s15 + $0x10] sm:$0xff] %v2155_v26  ;;  %v2156_v27 = vld [vmem:[%s1931_s13 + $0x70] sm:$0xff] }
  0x6f   : > { %776 = vst [vmem:[%s729_s15 + $0x18] sm:$0xff] %v2156_v27 }
  0x70 PF: > { %798 = sbr.rel (!%p2665_p3) target bundleno = 124 (0x7c), region = 298  ;;  %s800_s21 = sand.u32 (%p2665_p3), 1, %s2510_s22  }
  0x71   : > { %s2158_s9 = sshll.u32 (%p2665_p3), %s2526_s26, 3  ;;  %s2157_s8 = sshll.u32 (%p2665_p3), %s800_s21, 5 }
  0x72   : > { %s804_s28 = sadd.s32 (%p2665_p3), %s2522_s25, %s2158_s9  ;;  %s3058_s11 = sld [smem:[#allocation22_spill]] (%p2665_p3) }
  0x73   : > { %s2159_s30 = sshll.u32 (%p2665_p3), %s804_s28, 3  ;;  %s802_s23 = scalar_lea.vmem (%p2665_p3), [#allocation12], %s2157_s8 }
  0x78   : > { %s806_s19 = scalar_lea.vmem %s3058_s11, %s2159_s30 }
  0x79   : > { %v841_v28 = vld [vmem:[%s806_s19] sm:$0xff]  ;;  %v843_v29 = vld [vmem:[%s806_s19 + $0x10] sm:$0xff] }
  0x7a   : > { %v845_v30 = vld [vmem:[%s806_s19 + $0x20] sm:$0xff]  ;;  %842 = vst [vmem:[%s802_s23] sm:$0xff] %v841_v28  ;;  %844 = vst [vmem:[%s802_s23 + $0x8] sm:$0xff] %v843_v29  ;;  %v847_v31 = vld [vmem:[%s806_s19 + $0x30] sm:$0xff] }
  0x7b   : > { %846 = vst [vmem:[%s802_s23 + $0x10] sm:$0xff] %v845_v30  ;;  %848 = vst [vmem:[%s802_s23 + $0x18] sm:$0xff] %v847_v31 }
  0x7c PF: > { %p2160_p13 = scmp.ge.s32.totalorder %s2530_s27, 1  ;;  %p853_p0 = scmp.lt.s32.totalorder %s2530_s27, 5 }
  0x7e   : > { %p854_p1 = pnand %p2160_p13, %p853_p0 }
  0x7f   : > { %s3059_s14 = sld [smem:[#allocation16_spill]] (!%p854_p1)  ;;  %s881_s13 = sand.u32 (!%p854_p1), 1, %s2490_s17  }
  0x80   : > { %857 = sbr.rel (%p854_p1) target bundleno = 998 (0x3e6), region = 336  ;;  %s3060_s7 = sld [smem:[#allocation13_spill]] (!%p854_p1) }
  0x81   : > { %s2774_s15 = sshll.u32 (!%p854_p1), %s881_s13, 5  ;;  %s3061_s28 = sld [smem:[#allocation21_spill]] (!%p854_p1) }
  0x82   : > { %s883_s11 = scalar_lea.vmem (!%p854_p1), [#allocation8], %s2774_s15  ;;  %s3062_s19 = sld [smem:[#allocation14_spill]] (!%p854_p1) }
  0x83   : > { %s3063_s13 = sld [smem:[#allocation19_spill]] (!%p854_p1) }
  0x85   : > { %p993_p2 = scmp.lt.s32.totalorder %s3059_s14, 1  ;;  %v2532_v32 = vmov 0.0   ;;  %vm1081_vm0 = vcmask 195584   ;;  %vm1015_vm1 = vcmask 64512   ;;  %vm2533_vm2 = vmmov 0   ;;  %v1028_v35 = vld [vmem:[%s883_s11] sm:$0xff] }
  0x86   : > { %2247 = vmatprep.subr.mxu0 %v2532_v32  ;;  %2258 = vmatprep.subr.mxu1 %v2532_v32  ;;  %s874_s21 = sand.u32 1, %s3060_s7   ;;  %vm1040_vm3 = vcmask 60416   ;;  %v1029_v36 = vld [vmem:[%s883_s11 + $0x8] sm:$0xff]  ;;  %v1030_v37 = vld [vmem:[%s883_s11 + $0x10] sm:$0xff]  ;;  %1032 = vst.msk [vmem:[#allocation2 + $0x10] sm:$0xff] %vm1015_vm1, %v1028_v35  ;;  %v1031_v40 = vld [vmem:[%s883_s11 + $0x18] sm:$0xff] }
  0x87   : > { %v1077_v33 = vld [vmem:[%s3061_s28] sm:$0xff]  ;;  %v1078_v34 = vld [vmem:[%s3061_s28 + $0x8] sm:$0xff]  ;;  %s3083_s14 = smov (!%p993_p2, %s3059_s14), 1  ;;  %2255 = vmatprep.mubr.msk.f32.mxu0 %vm2533_vm2, %v2532_v32  ;;  %2266 = vmatprep.mubr.msk.f32.mxu1 %vm2533_vm2, %v2532_v32  ;;  %s2792_s17 = sshll.u32 %s874_s21, 5  ;;  %1033 = vst.msk [vmem:[#allocation2 + $0x30] sm:$0xff] %vm1015_vm1, %v1029_v36  ;;  %1034 = vst.msk [vmem:[#allocation2 + $0x50] sm:$0xff] %vm1015_vm1, %v1030_v37 }
  0x88   : > { %1082 = vst.msk [vmem:[#allocation4] sm:$0xff] %vm1081_vm0, %v1077_v33  ;;  %1083 = vst.msk [vmem:[#allocation4 + $0x8] sm:$0xff] %vm1081_vm0, %v1078_v34  ;;  %s2205_s6 = sshll.u32 %s3083_s14, 4  ;;  %s876_s8 = scalar_lea.vmem [#allocation7], %s2792_s17  ;;  %v1079_v11 = vld [vmem:[%s3061_s28 + $0x10] sm:$0xff]  ;;  %v1080_v12 = vld [vmem:[%s3061_s28 + $0x18] sm:$0xff] }
  0x89   : > { %s997_s9 = scalar_lea.vmem %s3063_s13, %s2205_s6  ;;  %v1020_v38 = vld [vmem:[%s876_s8] sm:$0xff]  ;;  %v1021_v39 = vld [vmem:[%s876_s8 + $0x8] sm:$0xff]  ;;  %s860_s21 = sand.u32 1, %s3062_s19   ;;  %1035 = vst.msk [vmem:[#allocation2 + $0x70] sm:$0xff] %vm1015_vm1, %v1031_v40  ;;  %v1022_v43 = vld [vmem:[%s876_s8 + $0x10] sm:$0xff]  ;;  %vm1106_vm4 = vcmask 228544  }
  0x8a   : > { %v1036_v41 = vld [vmem:[%s997_s9] sm:$0xf]  ;;  %v1037_v42 = vld [vmem:[%s997_s9 + $0x4] sm:$0xf]  ;;  %1024 = vst.msk [vmem:[#allocation2 + $0x8] sm:$0xff] %vm1015_vm1, %v1020_v38  ;;  %1025 = vst.msk [vmem:[#allocation2 + $0x28] sm:$0xff] %vm1015_vm1, %v1021_v39 }
  0x8b   : > { %1041 = vst.msk [vmem:[#allocation2 + $0x18] sm:$0xf] %vm1040_vm3, %v1036_v41  ;;  %1042 = vst.msk [vmem:[#allocation2 + $0x38] sm:$0xf] %vm1040_vm3, %v1037_v42  ;;  %s2811_s30 = sshll.u32 %s860_s21, 5  ;;  %v1023_v46 = vld [vmem:[%s876_s8 + $0x18] sm:$0xff] }
  0x8c   : > { %v1038_v44 = vld [vmem:[%s997_s9 + $0x8] sm:$0xf]  ;;  %v1039_v45 = vld [vmem:[%s997_s9 + $0xc] sm:$0xf]  ;;  %1026 = vst.msk [vmem:[#allocation2 + $0x48] sm:$0xff] %vm1015_vm1, %v1022_v43  ;;  %1027 = vst.msk [vmem:[#allocation2 + $0x68] sm:$0xff] %vm1015_vm1, %v1023_v46 }
  0x8d   : > { %1043 = vst.msk [vmem:[#allocation2 + $0x58] sm:$0xf] %vm1040_vm3, %v1038_v44  ;;  %1044 = vst.msk [vmem:[#allocation2 + $0x78] sm:$0xf] %vm1040_vm3, %v1039_v45  ;;  %s869_s16 = scalar_lea.vmem [#allocation6], %s2811_s30  ;;  %s911_s11 = scalar_lea.vmem [#allocation12], %s2811_s30 }
  0x8e   : > { %v1011_v47 = vld [vmem:[%s869_s16] sm:$0xff]  ;;  %v1012_v48 = vld [vmem:[%s869_s16 + $0x8] sm:$0xff]  ;;  %v1013_v49 = vld [vmem:[%s869_s16 + $0x10] sm:$0xff]  ;;  %s2534_s19 = smov 24   ;;  %s2842_s23 = scalar_lea.vmem [#allocation5], %s2811_s30  ;;  %1084 = vst.msk [vmem:[#allocation4 + $0x10] sm:$0xff] %vm1081_vm0, %v1079_v11 }
  0x8f   : > { %1016 = vst.msk [vmem:[#allocation2] sm:$0xff] %vm1015_vm1, %v1011_v47  ;;  %1017 = vst.msk [vmem:[#allocation2 + $0x20] sm:$0xff] %vm1015_vm1, %v1012_v48  ;;  %v1014_v50 = vld [vmem:[%s869_s16 + $0x18] sm:$0xff]  ;;  %v1086_v51 = vld [vmem:[%s911_s11] sm:$0xff]  ;;  %vm1475_vm5 = vcmask 228352   ;;  %s2910_s7 = scalar_lea.vmem [#allocation11], %s2774_s15 }
  0x90   : > { %1018 = vst.msk [vmem:[#allocation2 + $0x40] sm:$0xff] %vm1015_vm1, %v1013_v49  ;;  %1019 = vst.msk [vmem:[#allocation2 + $0x60] sm:$0xff] %vm1015_vm1, %v1014_v50  ;;  %1094 = vrot.lane.b32.xlu0 %v1086_v51, %s2534_s19  ;;  %v1117_v54 = vld [vmem:[#allocation2 + $0x10] sm:$0xff]  ;;  %v1087_v56 = vld [vmem:[%s911_s11 + $0x8] sm:$0xff]  ;;  %s2922_s13 = scalar_lea.vmem [#allocation9], %s2811_s30  ;;  %vm1539_vm6 = vcmask 1043456  }
  0x91   : > { %v1121_v55 = vld [vmem:[#allocation2 + $0x30] sm:$0xff]  ;;  %v1089_v58 = vld [vmem:[%s911_s11 + $0x18] sm:$0xff]  ;;  %v1116_v59 = vld [vmem:[#allocation2 + $0x8] sm:$0xff]  ;;  %1085 = vst.msk [vmem:[#allocation4 + $0x18] sm:$0xff] %vm1081_vm0, %v1080_v12  ;;  %s3065_s15 = sld [smem:[#allocation15_spill]]  ;;  %vm1846_vm7 = vcmask 130112  }
  0x92   : > { %v1118_v52 = vld [vmem:[#allocation2 + $0x18] sm:$0xf]  ;;  %v1088_v57 = vld [vmem:[%s911_s11 + $0x10] sm:$0xff]  ;;  %v1120_v60 = vld [vmem:[#allocation2 + $0x28] sm:$0xff]  ;;  %s3064_s11 = sld [smem:[#allocation20_spill]]  ;;  %vm1852_vm8 = vcmask 195712  }
  0x93   : > { %v1122_v53 = vld [vmem:[#allocation2 + $0x38] sm:$0xf]  ;;  %2248 = vmatpush3.xpose.msk.msra.mxu0 %vm1015_vm1, %v1118_v52  ;;  %1098 = vrot.lane.b32.xlu1 %v1088_v57, %s2534_s19  ;;  %v1111_v63 = vld [vmem:[%s2842_s23] sm:$0xff]  ;;  %v1112_v0 = vld [vmem:[%s2842_s23 + $0x8] sm:$0xff]  ;;  %s3066_s16 = sld [smem:[#allocation23_spill]]  ;;  %vm1858_vm9 = vcmask 261312  }
  0x94   : > { %2259 = vmatpush3.xpose.msk.msra.mxu1 %vm1015_vm1, %v1122_v53  ;;  %2249 = vmatprep.subr.mxu0 %v2532_v32  ;;  %v1126_v1 = vld [vmem:[#allocation2 + $0x58] sm:$0xf]  ;;  %v1125_v3 = vld [vmem:[#allocation2 + $0x50] sm:$0xff]  ;;  %v1124_v5 = vld [vmem:[#allocation2 + $0x48] sm:$0xff] }
  0x95   : > { %2260 = vmatprep.subr.mxu1 %v2532_v32  ;;  %1096 = vrot.lane.b32.xlu0 %v1087_v56, %s2534_s19  ;;  %v1130_v2 = vld [vmem:[#allocation2 + $0x78] sm:$0xf]  ;;  %v1129_v4 = vld [vmem:[#allocation2 + $0x70] sm:$0xff]  ;;  %v1128_v6 = vld [vmem:[#allocation2 + $0x68] sm:$0xff] }
  0x96   : > { %v1115_v61 = vld [vmem:[#allocation2] sm:$0xff]  ;;  %v1113_v9 = vld [vmem:[%s2842_s23 + $0x10] sm:$0xff]  ;;  %v1114_v10 = vld [vmem:[%s2842_s23 + $0x18] sm:$0xff] }
  0x97   : > { %2250 = vmatpush3.xpose.msk.msra.mxu0 %vm1015_vm1, %v1117_v54  ;;  %1100 = vrot.lane.b32.xlu1 %v1089_v58, %s2534_s19  ;;  %v1119_v62 = vld [vmem:[#allocation2 + $0x20] sm:$0xff]  ;;  %v1062_v57 = vld [vmem:[%s2910_s7 + $0x8] sm:$0xff]  ;;  %v1063_v11 = vld [vmem:[%s2910_s7 + $0x10] sm:$0xff]  ;;  %p1005_p3 = scmp.lt.s32.totalorder %s3065_s15, 1 }
  0x98   : > { %2261 = vmatpush3.xpose.msk.msra.mxu1 %vm1015_vm1, %v1121_v55  ;;  %2251 = vmatprep.subr.mxu0 %v2532_v32  ;;  %v1123_v7 = vld [vmem:[#allocation2 + $0x40] sm:$0xff]  ;;  %s2903_s23 = scalar_lea.vmem %s3064_s11, %s2205_s6  ;;  %1066 = vst.msk [vmem:[#allocation3 + $0x30] sm:$0xff] %vm1015_vm1, %v1062_v57  ;;  %s2917_s6 = scalar_lea.vmem [#allocation10], %s2792_s17  ;;  %1067 = vst.msk [vmem:[#allocation3 + $0x50] sm:$0xff] %vm1015_vm1, %v1063_v11 }
  0x99   : > { %2262 = vmatprep.subr.mxu1 %v2532_v32  ;;  %v1127_v8 = vld [vmem:[#allocation2 + $0x60] sm:$0xff]  ;;  %v1055_v12 = vld [vmem:[%s2917_s6 + $0x10] sm:$0xff]  ;;  %s3085_s15 = smov (!%p1005_p3, %s3065_s15), 1  ;;  %s2173_s17 = sshll.u32 %s3083_s14, 1 }
  0x9a   : > { %v1069_v54 = vld [vmem:[%s2903_s23] sm:$0xf]  ;;  %v1070_v55 = vld [vmem:[%s2903_s23 + $0x4] sm:$0xf]  ;;  %1059 = vst.msk [vmem:[#allocation3 + $0x48] sm:$0xff] %vm1015_vm1, %v1055_v12  ;;  %s1008_s30 = sadd.s32 %s2173_s17, %s3085_s15 }
  0x9b   : > { %2252 = vmatpush3.xpose.msk.msra.mxu0 %vm1015_vm1, %v1116_v59  ;;  %1073 = vst.msk [vmem:[#allocation3 + $0x18] sm:$0xf] %vm1040_vm3, %v1069_v54  ;;  %1074 = vst.msk [vmem:[#allocation3 + $0x38] sm:$0xf] %vm1040_vm3, %v1070_v55  ;;  %v1061_v56 = vld [vmem:[%s2910_s7] sm:$0xff]  ;;  %v1054_v59 = vld [vmem:[%s2917_s6 + $0x8] sm:$0xff] }
  0x9c   : > { %2263 = vmatpush3.xpose.msk.msra.mxu1 %vm1015_vm1, %v1120_v60  ;;  %2253 = vmatprep.subr.mxu0 %v2532_v32  ;;  %1065 = vst.msk [vmem:[#allocation3 + $0x10] sm:$0xff] %vm1015_vm1, %v1061_v56  ;;  %v1053_v58 = vld [vmem:[%s2917_s6] sm:$0xff]  ;;  %1058 = vst.msk [vmem:[#allocation3 + $0x28] sm:$0xff] %vm1015_vm1, %v1054_v59  ;;  %s2174_s9 = sshll.u32 %s1008_s30, 3 }
  0x9d   : > { %2264 = vmatprep.subr.mxu1 %v2532_v32  ;;  %v1045_v60 = vld [vmem:[%s2922_s13] sm:$0xff]  ;;  %1057 = vst.msk [vmem:[#allocation3 + $0x8] sm:$0xff] %vm1015_vm1, %v1053_v58  ;;  %s1010_s11 = scalar_lea.vmem %s3066_s16, %s2174_s9 }
  0x9e   : > { %1049 = vst.msk [vmem:[#allocation3] sm:$0xff] %vm1015_vm1, %v1045_v60 }
  0x9f   : > { %2254 = vmatpush3.xpose.msk.msra.mxu0 %vm1015_vm1, %v1115_v61 }
  0xa0   : > { %2265 = vmatpush3.xpose.msk.msra.mxu1 %vm1015_vm1, %v1119_v62  ;;  %2269 = vmatprep.subr.mxu0 %v2532_v32  ;;  %v1046_v62 = vld [vmem:[%s2922_s13 + $0x8] sm:$0xff] }
  0xa1   : > { %2280 = vmatprep.subr.mxu1 %v2532_v32  ;;  %1050 = vst.msk [vmem:[#allocation3 + $0x20] sm:$0xff] %vm1015_vm1, %v1046_v62 }
  0xa2   : > { %2256 = vmatmul.mubr.msk.f32.vlgmr.msra.gmra.mxu0 %vm1015_vm1, %v1111_v63 }
  0xa3   : > { %2267 = vmatmul.mubr.msk.f32.vlgmr.msra.gmra.mxu1 %vm1015_vm1, %v1112_v0  ;;  %2270 = vmatpush3.xpose.msk.msra.mxu0 %vm1015_vm1, %v1126_v1 }
  0xa4   : > { %2281 = vmatpush3.xpose.msk.msra.mxu1 %vm1015_vm1, %v1130_v2  ;;  %2271 = vmatprep.subr.mxu0 %v2532_v32  ;;  %v1523_v2 = vld [vmem:[#allocation3 + $0x18] sm:$0xf] }
  0xa5   : > { %2282 = vmatprep.subr.mxu1 %v2532_v32  ;;  %2277 = vmatprep.mubr.msk.f32.mxu0 %vm2533_vm2, %v2532_v32 }
  0xa6   : > { %2288 = vmatprep.mubr.msk.f32.mxu1 %vm2533_vm2, %v2532_v32 }
  0xa7   : > { %2272 = vmatpush3.xpose.msk.msra.mxu0 %vm1015_vm1, %v1125_v3  ;;  %v1527_v3 = vld [vmem:[#allocation3 + $0x38] sm:$0xf] }
  0xa8   : > { %2283 = vmatpush3.xpose.msk.msra.mxu1 %vm1015_vm1, %v1129_v4  ;;  %2273 = vmatprep.subr.mxu0 %v2532_v32  ;;  %v1522_v4 = vld [vmem:[#allocation3 + $0x10] sm:$0xff] }
  0xa9   : > { %2284 = vmatprep.subr.mxu1 %v2532_v32 }
  0xab   : > { %2274 = vmatpush3.xpose.msk.msra.mxu0 %vm1015_vm1, %v1124_v5  ;;  %v1526_v5 = vld [vmem:[#allocation3 + $0x30] sm:$0xff] }
  0xac   : > { %2285 = vmatpush3.xpose.msk.msra.mxu1 %vm1015_vm1, %v1128_v6  ;;  %2275 = vmatprep.subr.mxu0 %v2532_v32  ;;  %v1521_v6 = vld [vmem:[#allocation3 + $0x8] sm:$0xff] }
  0xad   : > { %2286 = vmatprep.subr.mxu1 %v2532_v32 }
  0xaf   : > { %2276 = vmatpush3.xpose.msk.msra.mxu0 %vm1015_vm1, %v1123_v7  ;;  %v1525_v7 = vld [vmem:[#allocation3 + $0x28] sm:$0xff] }
  0xb0   : > { %2287 = vmatpush3.xpose.msk.msra.mxu1 %vm1015_vm1, %v1127_v8  ;;  %2291 = vmatprep.subr.mxu0 %v2532_v32  ;;  %v1520_v8 = vld [vmem:[#allocation3] sm:$0xff] }
  0xb1   : > { %2302 = vmatprep.subr.mxu1 %v2532_v32 }
  0xb2   : > { %2278 = vmatmul.mubr.msk.f32.vlgmr.msra.gmra.mxu0 %vm1015_vm1, %v1113_v9  ;;  %v1524_v9 = vld [vmem:[#allocation3 + $0x20] sm:$0xff] }
  0xb3   : > { %2289 = vmatmul.mubr.msk.f32.vlgmr.msra.gmra.mxu1 %vm1015_vm1, %v1114_v10  ;;  %2299 = vmatprep.mubr.msk.f32.mxu0 %vm2533_vm2, %v2532_v32  ;;  %v1071_v10 = vld [vmem:[%s2903_s23 + $0x8] sm:$0xf] }
  0xb4   : > { %2310 = vmatprep.mubr.msk.f32.mxu1 %vm2533_vm2, %v2532_v32  ;;  %2292 = vmatpush3.msk.msra.mxu0 %vm1539_vm6, %v1523_v2  ;;  %1075 = vst.msk [vmem:[#allocation3 + $0x58] sm:$0xf] %vm1040_vm3, %v1071_v10 }
  0xb5   : > { %2303 = vmatpush3.msk.msra.mxu1 %vm1539_vm6, %v1527_v3  ;;  %2293 = vmatprep.subr.mxu0 %v2532_v32 }
  0xb6   : > { %2304 = vmatprep.subr.mxu1 %v2532_v32  ;;  %2294 = vmatpush3.msra.mxu0 %v1522_v4 }
  0xb7   : > { %2305 = vmatpush3.msra.mxu1 %v1526_v5  ;;  %2295 = vmatprep.subr.mxu0 %v2532_v32 }
  0xb8   : > { %2306 = vmatprep.subr.mxu1 %v2532_v32  ;;  %2296 = vmatpush3.msra.mxu0 %v1521_v6 }
  0xb9   : > { %2307 = vmatpush3.msra.mxu1 %v1525_v7  ;;  %2297 = vmatprep.subr.mxu0 %v2532_v32 }
  0xba   : > { %2308 = vmatprep.subr.mxu1 %v2532_v32  ;;  %2298 = vmatpush3.msra.mxu0 %v1520_v8 }
  0xbb   : > { %2309 = vmatpush3.msra.mxu1 %v1524_v9  ;;  %2313 = vmatprep.subr.mxu0 %v2532_v32 }
  0xbc   : > { %2324 = vmatprep.subr.mxu1 %v2532_v32 }
 0x102   : > { %v1095_v13 = vpop.permute.xlu0 %1094 }
 0x103   : > { %1107 = vst.msk [vmem:[#allocation4] sm:$0xff] %vm1106_vm4, %v1095_v13  ;;  %v1072_v13 = vld [vmem:[%s2903_s23 + $0xc] sm:$0xf]  ;;  %s2535_s23 = smov 8  }
 0x104   : > { %1076 = vst.msk [vmem:[#allocation3 + $0x78] sm:$0xf] %vm1040_vm3, %v1072_v13 }
 0x105   : > { %v1099_v15 = vpop.permute.xlu1 %1098 }
 0x106   : > { %1109 = vst.msk [vmem:[#allocation4 + $0x10] sm:$0xff] %vm1106_vm4, %v1099_v15  ;;  %v1064_v15 = vld [vmem:[%s2910_s7 + $0x18] sm:$0xff]  ;;  %s2536_s7 = smov 16  }
 0x107   : > { %v1097_v14 = vpop.permute.xlu0 %1096  ;;  %1068 = vst.msk [vmem:[#allocation3 + $0x70] sm:$0xff] %vm1015_vm1, %v1064_v15 }
 0x108   : > { %1108 = vst.msk [vmem:[#allocation4 + $0x8] sm:$0xff] %vm1106_vm4, %v1097_v14  ;;  %v1047_v14 = vld [vmem:[%s2922_s13 + $0x10] sm:$0xff] }
 0x109   : > { %v1101_v16 = vpop.permute.xlu1 %1100  ;;  %1051 = vst.msk [vmem:[#allocation3 + $0x40] sm:$0xff] %vm1015_vm1, %v1047_v14 }
 0x10a   : > { %1110 = vst.msk [vmem:[#allocation4 + $0x18] sm:$0xff] %vm1106_vm4, %v1101_v16  ;;  %v1131_v17 = vld [vmem:[#allocation4] sm:$0xff]  ;;  %v1056_v16 = vld [vmem:[%s2917_s6 + $0x18] sm:$0xff] }
 0x10b   : > { %1060 = vst.msk [vmem:[#allocation3 + $0x68] sm:$0xff] %vm1015_vm1, %v1056_v16 }
 0x10d   : > { %v1133_v27 = vld [vmem:[#allocation4 + $0x10] sm:$0xff] }
 0x10f   : > { %v1132_v18 = vld [vmem:[#allocation4 + $0x8] sm:$0xff] }
 0x111   : > { %v1134_v28 = vld [vmem:[#allocation4 + $0x18] sm:$0xff] }
 0x162   : > { %v1216_v19 = vpop.f32.mrf.mxu0 }
 0x163   : > { %v1301_v20 = vpop.f32.mrf.mxu1  ;;  %v1217_v21 = vadd.f32 %v1216_v19, %v1131_v17  ;;  %v1048_v17 = vld [vmem:[%s2922_s13 + $0x18] sm:$0xff] }
 0x164   : > { %v1302_v22 = vadd.f32 %v1301_v20, %v1132_v18  ;;  %v2257_v23 = vpop.f32.mrf.mxu0  ;;  %1052 = vst.msk [vmem:[#allocation3 + $0x60] sm:$0xff] %vm1015_vm1, %v1048_v17 }
 0x165   : > { %v2268_v24 = vpop.f32.mrf.mxu1  ;;  %v1476_v26 = vsel %vm1475_vm5, %v1217_v21, -inf  ;;  %v1535_v23 = vld [vmem:[#allocation3 + $0x78] sm:$0xf] }
 0x166   : > { %v1479_v25 = vsel %vm1475_vm5, %v1302_v22, -inf  ;;  %1477 = vmax.xlane.f32.xlu0 %v1476_v26  ;;  %v1531_v26 = vld [vmem:[#allocation3 + $0x58] sm:$0xf] }
 0x167   : > { %1480 = vmax.xlane.f32.xlu1 %v1479_v25 }
 0x172   : > { %v1386_v29 = vpop.f32.mrf.mxu0 }
 0x173   : > { %v1471_v30 = vpop.f32.mrf.mxu1  ;;  %v1387_v31 = vadd.f32 %v1386_v29, %v1133_v27  ;;  %v1530_v27 = vld [vmem:[#allocation3 + $0x50] sm:$0xff] }
 0x174   : > { %v1472_v33 = vadd.f32 %v1471_v30, %v1134_v28  ;;  %v2279_v34 = vpop.f32.mrf.mxu0  ;;  %v1534_v28 = vld [vmem:[#allocation3 + $0x70] sm:$0xff]  ;;  %v1529_v30 = vld [vmem:[#allocation3 + $0x48] sm:$0xff] }
 0x175   : > { %v2290_v35 = vpop.f32.mrf.mxu1  ;;  %v1482_v36 = vsel %vm1475_vm5, %v1387_v31, -inf  ;;  %v1532_v34 = vld [vmem:[#allocation3 + $0x60] sm:$0xff] }
 0x176   : > { %1483 = vmax.xlane.f32.xlu0 %v1482_v36  ;;  %v1485_v37 = vsel %vm1475_vm5, %v1472_v33, -inf }
 0x17a   : > { %1486 = vmax.xlane.f32.xlu0 %v1485_v37 }
 0x1ef   : > { %v1478_v39 = vpop.xlane.xlu0 %1477 }
 0x1f0   : > { %v1481_v38 = vpop.xlane.xlu1 %1480  ;;  %v1488_v41 = vsub.f32 %v1217_v21, %v1478_v39 }
 0x1f1   : > { %v1489_v40 = vsub.f32 %v1302_v22, %v1481_v38 }
 0x1f2   : > { %v1492_v43 = vmul.f32 1.442695, %v1488_v41 }
 0x1f3   : > { %v1494_v42 = vmul.f32 1.442695, %v1489_v40 }
 0x1f5   : > { %2428 = vpow2.f32 %v1494_v42 }
 0x1f6   : > { %2430 = vpow2.f32 %v1492_v43 }
 0x1ff   : > { %v1484_v44 = vpop.xlane.xlu0 %1483 }
 0x200   : > { %v1490_v45 = vsub.f32 %v1387_v31, %v1484_v44  ;;  %v1533_v31 = vld [vmem:[#allocation3 + $0x68] sm:$0xff] }
 0x202   : > { %v2890_v46 = vpop.eup %2428  ;;  %v1496_v48 = vmul.f32 1.442695, %v1490_v45 }
 0x203   : > { %v2892_v47 = vpop.eup %2430  ;;  %v1503_v49 = vsel %vm1475_vm5, %v2890_v46, 0.0  ;;  %v1487_v51 = vpop.xlane.xlu0 %1486 }
 0x204   : > { %v1500_v50 = vsel %vm1475_vm5, %v2892_v47, 0.0  ;;  %1504 = vadd.xlane.f32.xlu0 %v1503_v49  ;;  %2432 = vpow2.f32 %v1496_v48  ;;  %v1491_v52 = vsub.f32 %v1472_v33, %v1487_v51  ;;  %v1528_v33 = vld [vmem:[#allocation3 + $0x40] sm:$0xff] }
 0x205   : > { %1501 = vadd.xlane.f32.xlu1 %v1500_v50 }
 0x206   : > { %v1498_v53 = vmul.f32 1.442695, %v1491_v52 }
 0x208   : > { %2434 = vpow2.f32 %v1498_v53 }
 0x211   : > { %v2925_v61 = vpop.eup %2432 }
 0x212   : > { %v1506_v63 = vsel %vm1475_vm5, %v2925_v61, 0.0 }
 0x213   : > { %1507 = vadd.xlane.f32.xlu1 %v1506_v63 }
 0x215   : > { %v2934_v0 = vpop.eup %2434 }
 0x216   : > { %v1509_v1 = vsel %vm1475_vm5, %v2934_v0, 0.0 }
 0x217   : > { %1510 = vadd.xlane.f32.xlu0 %v1509_v1 }
 0x28d   : > { %v1505_v18 = vpop.xlane.xlu0 %1504 }
 0x28e   : > { %v1502_v19 = vpop.xlane.xlu1 %1501  ;;  %2436 = vrcp.f32 %v1505_v18 }
 0x28f   : > { %2438 = vrcp.f32 %v1502_v19 }
 0x29b   : > { %v2437_v20 = vpop.eup %2436 }
 0x29c   : > { %v2439_v21 = vpop.eup %2438  ;;  %v1517_v22 = vmul.f32 %v2437_v20, %v2890_v46  ;;  %v1508_v24 = vpop.xlane.xlu1 %1507 }
 0x29d   : > { %v1516_v25 = vmul.f32 %v2439_v21, %v2892_v47  ;;  %2440 = vrcp.f32 %v1508_v24 }
 0x29e   : > { %2311 = vmatmul.mubr.msk.f32.vlgmr.msra.gmra.mxu1 %vm1475_vm5, %v1517_v22 }
 0x29f   : > { %2300 = vmatmul.mubr.msk.f32.vlgmr.msra.gmra.mxu0 %vm1475_vm5, %v1516_v25  ;;  %2325 = vmatpush3.msk.msra.mxu1 %vm1539_vm6, %v1535_v23 }
 0x2a0   : > { %2314 = vmatpush3.msk.msra.mxu0 %vm1539_vm6, %v1531_v26  ;;  %2326 = vmatprep.subr.mxu1 %v2532_v32  ;;  %v1511_v29 = vpop.xlane.xlu0 %1510 }
 0x2a1   : > { %2315 = vmatprep.subr.mxu0 %v2532_v32  ;;  %2321 = vmatprep.mubr.msk.f32.mxu0 %vm2533_vm2, %v2532_v32  ;;  %2442 = vrcp.f32 %v1511_v29 }
 0x2a2   : > { %2316 = vmatpush3.msra.mxu0 %v1530_v27  ;;  %2327 = vmatpush3.msra.mxu1 %v1534_v28 }
 0x2a3   : > { %2317 = vmatprep.subr.mxu0 %v2532_v32  ;;  %2328 = vmatprep.subr.mxu1 %v2532_v32 }
 0x2a4   : > { %2318 = vmatpush3.msra.mxu0 %v1529_v30  ;;  %2329 = vmatpush3.msra.mxu1 %v1533_v31 }
 0x2a5   : > { %2319 = vmatprep.subr.mxu0 %v2532_v32  ;;  %2330 = vmatprep.subr.mxu1 %v2532_v32 }
 0x2a6   : > { %2320 = vmatpush3.msra.mxu0 %v1528_v33  ;;  %2331 = vmatpush3.msra.mxu1 %v1532_v34 }
 0x2a7   : > { %2332 = vmatprep.mubr.msk.f32.mxu1 %vm2533_vm2, %v2532_v32 }
 0x2aa   : > { %v2441_v35 = vpop.eup %2440 }
 0x2ab   : > { %v1518_v36 = vmul.f32 %v2441_v35, %v2925_v61 }
 0x2ad   : > { %2322 = vmatmul.mubr.msk.f32.vlgmr.msra.gmra.mxu0 %vm1475_vm5, %v1518_v36 }
 0x2ae   : > { %v2443_v37 = vpop.eup %2442 }
 0x2af   : > { %v1519_v38 = vmul.f32 %v2443_v37, %v2934_v0 }
 0x2b1   : > { %2333 = vmatmul.mubr.msk.f32.vlgmr.msra.gmra.mxu1 %vm1475_vm5, %v1519_v38 }
 0x35e   : > { %v1685_v32 = vpop.f32.mrf.mxu1 }
 0x35f   : > { %v1609_v39 = vpop.f32.mrf.mxu0  ;;  %1843 = vrot.lane.b32.xlu1 %v1685_v32, %s2535_s23 }
 0x360   : > { %1841 = vst.msk [vmem:[%s1010_s11] sm:$0xff] %vm1015_vm1, %v1609_v39  ;;  %v2312_v40 = vpop.f32.mrf.mxu1 }
 0x361   : > { %v2301_v41 = vpop.f32.mrf.mxu0 }
 0x36d   : > { %v1761_v42 = vpop.f32.mrf.mxu0 }
 0x36e   : > { %1849 = vrot.lane.b32.xlu0 %v1761_v42, %s2536_s7 }
 0x36f   : > { %v2323_v43 = vpop.f32.mrf.mxu0 }
 0x371   : > { %v1837_v44 = vpop.f32.mrf.mxu1 }
 0x372   : > { %1855 = vrot.lane.b32.xlu1 %v1837_v44, %s2534_s19 }
 0x373   : > { %v2334_v45 = vpop.f32.mrf.mxu1 }
 0x3d1   : > { %v1844_v46 = vpop.permute.xlu1 %1843 }
 0x3d2   : > { %1847 = vst.msk [vmem:[%s1010_s11] sm:$0xff] %vm1846_vm7, %v1844_v46 }
 0x3e0   : > { %v1850_v47 = vpop.permute.xlu0 %1849 }
 0x3e1   : > { %1853 = vst.msk [vmem:[%s1010_s11] sm:$0xff] %vm1852_vm8, %v1850_v47 }
 0x3e4   : > { %v1856_v48 = vpop.permute.xlu1 %1855 }
 0x3e5   : > { %1859 = vst.msk [vmem:[%s1010_s11] sm:$0xff] %vm1858_vm9, %v1856_v48 }
 0x3e6 PF: > { %s21_s27 = sadd.s32 1, %s2530_s27   ;;  %s3067_s14 = sld [smem:[#allocation17_spill]] }
 0x3e7   : > { %p18_p4 = scmp.ge.s32.totalorder %s21_s27, 6   ;;  %s3068_s17 = smov %s2494_s18 }
 0x3e8   : > { %s3069_s18 = smov %s2695_s29  ;;  %s3070_s19 = smov %s2502_s20 }
 0x3e9   : > { %s3071_s20 = smov %s2689_s10  ;;  %s3072_s21 = smov %s2510_s22 }
 0x3ea   : > { %s3073_s22 = smov %s2686_s24  ;;  %s3074_s23 = smov %s2522_s25 }
 0x3eb   : > { %s3075_s24 = smov %s2526_s26  ;;  %s3076_s25 = smov %s2658_s12 }
 0x3ec   : > { %s3077_s26 = smov %s3067_s14  ;;  %20 = sbr.rel (!%p18_p4) target bundleno = 13 (0xd), region = 465 }

</bundles_post_ra>
